<compile_context>
chip_gen: v7x
topology: tpu7x:2x2x1
jax: 0.10.0
libtpu: 0.0.40
codegen_flags: <defaults>
</compile_context>

<pallas_src>
import jax
import jax.numpy as jnp
import numpy as np
from jax.experimental import pallas as pl
from jax.experimental.pallas import tpu as pltpu


def _ssm_kernel(x_ref,        # (T*B, D)    time-major, flattened
                wx_ref,       # (D, 4*HP)   fused x-side weights [gate | r | z | n]
                wh_ref,       # (HP, 4*HP)  fused h-side weights [gate | r | z | n]
                b_ref,        # (1, 4*HP)   fused biases [gate_b | b_ir+b_hr | b_iz+b_hz | b_in]
                bhn_ref,      # (1, HP)     GRU hidden-side "n" bias (must stay inside r*(...))
                out_ref,      # (B, HP)     last hidden state (lane padded)
                gi_ref):      # (T*B, 4*HP) VMEM scratch for the hoisted x projections
    TB, _ = x_ref.shape
    B, HP = out_ref.shape
    T = TB // B

    # ---- x-side projections: off the serial h-chain, one well-shaped matmul ----
    gi_ref[...] = (
        jnp.dot(x_ref[...], wx_ref[...], preferred_element_type=jnp.float32)
        + b_ref[...])

    # ---- hoist weight loads / bias broadcast out of the unrolled loop ----
    wh = wh_ref[...]
    bhn = jnp.broadcast_to(bhn_ref[...], (B, HP))

    h = jnp.zeros((B, HP), dtype=jnp.float32)
    for t in range(T):                        # T is static & small -> fully unrolled
        gi_t = gi_ref[pl.ds(t * B, B), :]     # (B, 4*HP) precomputed x-side pre-activations
        gh = jnp.dot(h, wh, preferred_element_type=jnp.float32)   # (B, 4*HP), 1 MXU push

        # Tile-aligned gate slices: each gate owns a full 128-lane block.
        g = jax.nn.sigmoid(gi_t[:, 0 * HP:1 * HP] + gh[:, 0 * HP:1 * HP])
        r = jax.nn.sigmoid(gi_t[:, 1 * HP:2 * HP] + gh[:, 1 * HP:2 * HP])
        z = jax.nn.sigmoid(gi_t[:, 2 * HP:3 * HP] + gh[:, 2 * HP:3 * HP])
        n = jnp.tanh(gi_t[:, 3 * HP:4 * HP] + r * (gh[:, 3 * HP:4 * HP] + bhn))

        h_new = (1.0 - z) * n + z * h         # GRU update
        h = g * h_new                         # selective gate
        # Attention branch: softmax over a size-1 axis == 1.0, so h *= 1 (elided).

    out_ref[...] = h


def selective_ssm_forward(x, params):
    """x: (B, T, D) or (B, D) float. Returns the last hidden state, shape (B, H)."""
    if x.ndim == 2:                           # mirrors the PyTorch unsqueeze(1)
        x = x[:, None, :]
    B, T, D = x.shape
    H = params["gate_w"].shape[0]
    HP = ((H + 127) // 128) * 128             # pad each gate slot to a 128-lane tile
    NG = 4 * HP
    f32 = jnp.float32

    gate_w, gate_b = params["gate_w"], params["gate_b"]     # (H, D+H), (H,)
    w_ih, w_hh = params["gru_w_ih"], params["gru_w_hh"]     # (3H, D), (3H, H)
    b_ih, b_hh = params["gru_b_ih"], params["gru_b_hh"]     # (3H,),   (3H,)
    # attention_layer / attention_score params are mathematically dead
    # (softmax over a size-1 dim) and never reach the kernel.

    # Fused x-side weights (D, 4*HP): blocks [gate | r | z | n], zero padded.
    wx = jnp.zeros((D, NG), f32)
    wx = wx.at[:, 0 * HP:0 * HP + H].set(gate_w[:, :D].T.astype(f32))
    wx = wx.at[:, 1 * HP:1 * HP + H].set(w_ih[0 * H:1 * H].T.astype(f32))
    wx = wx.at[:, 2 * HP:2 * HP + H].set(w_ih[1 * H:2 * H].T.astype(f32))
    wx = wx.at[:, 3 * HP:3 * HP + H].set(w_ih[2 * H:3 * H].T.astype(f32))

    # Fused h-side weights (HP, 4*HP); rows >= H are zero so the padded h lanes
    # can never contaminate the real lanes.
    wh = jnp.zeros((HP, NG), f32)
    wh = wh.at[:H, 0 * HP:0 * HP + H].set(gate_w[:, D:].T.astype(f32))
    wh = wh.at[:H, 1 * HP:1 * HP + H].set(w_hh[0 * H:1 * H].T.astype(f32))
    wh = wh.at[:H, 2 * HP:2 * HP + H].set(w_hh[1 * H:2 * H].T.astype(f32))
    wh = wh.at[:H, 3 * HP:3 * HP + H].set(w_hh[2 * H:3 * H].T.astype(f32))

    # Biases folded into the hoisted x projection; b_hn stays separate because
    # the GRU applies it inside r * (W_hn h + b_hn).
    b_all = jnp.zeros((1, NG), f32)
    b_all = b_all.at[0, 0 * HP:0 * HP + H].set(gate_b.astype(f32))
    b_all = b_all.at[0, 1 * HP:1 * HP + H].set((b_ih[0 * H:1 * H] + b_hh[0 * H:1 * H]).astype(f32))
    b_all = b_all.at[0, 2 * HP:2 * HP + H].set((b_ih[1 * H:2 * H] + b_hh[1 * H:2 * H]).astype(f32))
    b_all = b_all.at[0, 3 * HP:3 * HP + H].set(b_ih[2 * H:3 * H].astype(f32))
    b_hn = jnp.zeros((1, HP), f32).at[0, :H].set(b_hh[2 * H:3 * H].astype(f32))

    # Time-major and flattened so the hoisted x projection is one (T*B, D) matmul.
    x_tm = jnp.transpose(x.astype(f32), (1, 0, 2)).reshape(T * B, D)
    # NOTE: for scaled-up H/D/B on v6e/v7x, cast x_tm/wx/wh to bfloat16 (keep the
    # f32 accumulate + f32 elementwise) and add a batch grid axis marked
    # "parallel" so both v7x TensorCores are used; unnecessary at these sizes.

    vmem = pl.BlockSpec(memory_space=pltpu.MemorySpace.VMEM)
    out = pl.pallas_call(
        _ssm_kernel,
        out_shape=jax.ShapeDtypeStruct((B, HP), f32),
        in_specs=[vmem, vmem, vmem, vmem, vmem],      # exactly 5 inputs passed below
        out_specs=vmem,
        scratch_shapes=[pltpu.VMEM((T * B, NG), f32)],
        compiler_params=pltpu.CompilerParams(vmem_limit_bytes=32 * 1024 * 1024),
    )(x_tm, wx, wh, b_all, b_hn)
    return out[:, :H]


def _reference_forward(x, params):
    """Pure-JAX reference mirroring the PyTorch loop (attention included)."""
    B, T, D = x.shape
    H = params["gate_w"].shape[0]
    h = jnp.zeros((B, H), jnp.float32)
    for t in range(T):
        x_t = x[:, t, :]
        combined = jnp.concatenate([x_t, h], axis=-1)
        g = jax.nn.sigmoid(combined @ params["gate_w"].T + params["gate_b"])
        gi = x_t @ params["gru_w_ih"].T + params["gru_b_ih"]
        gh = h @ params["gru_w_hh"].T + params["gru_b_hh"]
        r = jax.nn.sigmoid(gi[:, :H] + gh[:, :H])
        z = jax.nn.sigmoid(gi[:, H:2 * H] + gh[:, H:2 * H])
        n = jnp.tanh(gi[:, 2 * H:] + r * gh[:, 2 * H:])
        h_new = (1.0 - z) * n + z * h
        h_new = g * h_new
        att_in = jnp.concatenate([h_new, h_new], axis=-1)
        att_h = jnp.tanh(att_in @ params["att_w"].T + params["att_b"])
        score = att_h @ params["score_w"].T + params["score_b"]     # (B, 1)
        aw = jax.nn.softmax(score, axis=1)                          # identically 1.0
        h = h_new * aw
    return h


def _init_params(key, input_dim, hidden_dim):
    """Deterministic init mimicking PyTorch's uniform(-1/sqrt(fan_in), +...)."""
    def u(k, shape, fan_in):
        bound = 1.0 / np.sqrt(fan_in)
        return jax.random.uniform(k, shape, jnp.float32, -bound, bound)

    ks = jax.random.split(key, 10)
    D, H = input_dim, hidden_dim
    return {
        "gate_w": u(ks[0], (H, D + H), D + H),
        "gate_b": u(ks[1], (H,), D + H),
        "gru_w_ih": u(ks[2], (3 * H, D), H),
        "gru_w_hh": u(ks[3], (3 * H, H), H),
        "gru_b_ih": u(ks[4], (3 * H,), H),
        "gru_b_hh": u(ks[5], (3 * H,), H),
        "att_w": u(ks[6], (H, 2 * H), 2 * H),
        "att_b": u(ks[7], (H,), 2 * H),
        "score_w": u(ks[8], (1, H), H),
        "score_b": u(ks[9], (1,), H),
    }


if __name__ == "__main__":
    B, T, D, H = 2, 8, 16, 32

    key = jax.random.PRNGKey(0)
    k_x, k_p = jax.random.split(key)
    x = jax.random.normal(k_x, (B, T, D), jnp.float32)
    params = _init_params(k_p, D, H)

    out = jax.block_until_ready(selective_ssm_forward(x, params))
    ref = jax.block_until_ready(_reference_forward(x, params))

    # Tolerance covers TPU MXU f32-pass differences between the Pallas matmuls
    # and the XLA reference; structural errors would be orders of magnitude larger.
    np.testing.assert_allclose(np.asarray(out), np.asarray(ref), rtol=5e-3, atol=5e-3)
    assert out.shape == (B, H)
    print("KERNEL_OK")
</pallas_src>

<mosaic_0001>
module attributes {stable_mosaic.version = 11 : i64} {
  func.func @_ssm_kernel(%arg0: memref<16x16xf32, #tpu.memory_space<vmem>>, %arg1: memref<16x512xf32, #tpu.memory_space<vmem>>, %arg2: memref<128x512xf32, #tpu.memory_space<vmem>>, %arg3: memref<1x512xf32, #tpu.memory_space<vmem>>, %arg4: memref<1x128xf32, #tpu.memory_space<vmem>>, %arg5: memref<2x128xf32, #tpu.memory_space<vmem>>, %arg6: memref<16x512xf32, #tpu.memory_space<vmem>>) attributes {dimension_semantics = [], scalar_prefetch = 0 : i64, scratch_operands = 1 : i64, tpu.core_type = #tpu.core_type<tc>} {
    %c0 = arith.constant 0 : index
    %c0_0 = arith.constant 0 : index
    %0 = vector.load %arg0[%c0, %c0_0] : memref<16x16xf32, #tpu.memory_space<vmem>>, vector<16x16xf32>
    %c0_1 = arith.constant 0 : index
    %c0_2 = arith.constant 0 : index
    %1 = vector.load %arg1[%c0_1, %c0_2] : memref<16x512xf32, #tpu.memory_space<vmem>>, vector<16x512xf32>
    %cst = arith.constant dense<0.000000e+00> : vector<16x512xf32>
    %2 = tpu.matmul %0, %1, %cst {dimension_numbers = #tpu.dot_dimension_numbers<[1], [0], [0], [1], [0, 0, 1, 1], [], []>} : vector<16x16xf32>, vector<16x512xf32>, vector<16x512xf32> -> vector<16x512xf32>
    %c0_3 = arith.constant 0 : index
    %c0_4 = arith.constant 0 : index
    %3 = vector.load %arg3[%c0_3, %c0_4] : memref<1x512xf32, #tpu.memory_space<vmem>>, vector<1x512xf32>
    %4 = vector.broadcast %3 : vector<1x512xf32> to vector<16x512xf32>
    %5 = arith.addf %2, %4 : vector<16x512xf32>
    %c0_5 = arith.constant 0 : index
    %c0_6 = arith.constant 0 : index
    %6 = vector.load %arg6[%c0_5, %c0_6] : memref<16x512xf32, #tpu.memory_space<vmem>>, vector<16x512xf32>
    tpu.vector_store %arg6[%c0_5, %c0_6], %5 {strides = array<i32>} : memref<16x512xf32, #tpu.memory_space<vmem>>, vector<16x512xf32>,
    %c0_7 = arith.constant 0 : index
    %c0_8 = arith.constant 0 : index
    %7 = vector.load %arg2[%c0_7, %c0_8] : memref<128x512xf32, #tpu.memory_space<vmem>>, vector<128x512xf32>
    %c0_9 = arith.constant 0 : index
    %c0_10 = arith.constant 0 : index
    %8 = vector.load %arg4[%c0_9, %c0_10] : memref<1x128xf32, #tpu.memory_space<vmem>>, vector<1x128xf32>
    %9 = vector.shape_cast %8 : vector<1x128xf32> to vector<1x128xf32>
    %10 = vector.broadcast %9 : vector<1x128xf32> to vector<2x128xf32>
    %cst_11 = arith.constant 0.000000e+00 : f32
    %11 = vector.broadcast %cst_11 : f32 to vector<2x128xf32>
    %c0_12 = arith.constant 0 : index
    %c0_13 = arith.constant 0 : index
    %12 = vector.load %arg6[%c0_12, %c0_13] : memref<16x512xf32, #tpu.memory_space<vmem>>, vector<2x512xf32>
    %cst_14 = arith.constant dense<0.000000e+00> : vector<2x512xf32>
    %13 = tpu.matmul %11, %7, %cst_14 {dimension_numbers = #tpu.dot_dimension_numbers<[1], [0], [0], [1], [0, 0, 1, 1], [], []>} : vector<2x128xf32>, vector<128x512xf32>, vector<2x512xf32> -> vector<2x512xf32>
    %14 = vector.extract_strided_slice %12 {offsets = [0, 0], sizes = [2, 128], strides = [1, 1]} : vector<2x512xf32> to vector<2x128xf32>
    %15 = vector.extract_strided_slice %13 {offsets = [0, 0], sizes = [2, 128], strides = [1, 1]} : vector<2x512xf32> to vector<2x128xf32>
    %16 = arith.addf %14, %15 : vector<2x128xf32>
    %17 = arith.negf %16 : vector<2x128xf32>
    %18 = math.exp %17 : vector<2x128xf32>
    %cst_15 = arith.constant 1.000000e+00 : f32
    %19 = vector.broadcast %cst_15 : f32 to vector<2x128xf32>
    %20 = arith.addf %19, %18 : vector<2x128xf32>
    %21 = arith.divf %19, %20 : vector<2x128xf32>
    %22 = vector.extract_strided_slice %12 {offsets = [0, 128], sizes = [2, 128], strides = [1, 1]} : vector<2x512xf32> to vector<2x128xf32>
    %23 = vector.extract_strided_slice %13 {offsets = [0, 128], sizes = [2, 128], strides = [1, 1]} : vector<2x512xf32> to vector<2x128xf32>
    %24 = arith.addf %22, %23 : vector<2x128xf32>
    %25 = arith.negf %24 : vector<2x128xf32>
    %26 = math.exp %25 : vector<2x128xf32>
    %cst_16 = arith.constant 1.000000e+00 : f32
    %27 = vector.broadcast %cst_16 : f32 to vector<2x128xf32>
    %28 = arith.addf %27, %26 : vector<2x128xf32>
    %29 = arith.divf %27, %28 : vector<2x128xf32>
    %30 = vector.extract_strided_slice %12 {offsets = [0, 256], sizes = [2, 128], strides = [1, 1]} : vector<2x512xf32> to vector<2x128xf32>
    %31 = vector.extract_strided_slice %13 {offsets = [0, 256], sizes = [2, 128], strides = [1, 1]} : vector<2x512xf32> to vector<2x128xf32>
    %32 = arith.addf %30, %31 : vector<2x128xf32>
    %33 = arith.negf %32 : vector<2x128xf32>
    %34 = math.exp %33 : vector<2x128xf32>
    %cst_17 = arith.constant 1.000000e+00 : f32
    %35 = vector.broadcast %cst_17 : f32 to vector<2x128xf32>
    %36 = arith.addf %35, %34 : vector<2x128xf32>
    %37 = arith.divf %35, %36 : vector<2x128xf32>
    %38 = vector.extract_strided_slice %12 {offsets = [0, 384], sizes = [2, 128], strides = [1, 1]} : vector<2x512xf32> to vector<2x128xf32>
    %39 = vector.extract_strided_slice %13 {offsets = [0, 384], sizes = [2, 128], strides = [1, 1]} : vector<2x512xf32> to vector<2x128xf32>
    %40 = arith.addf %39, %10 : vector<2x128xf32>
    %41 = arith.mulf %29, %40 : vector<2x128xf32>
    %42 = arith.addf %38, %41 : vector<2x128xf32>
    %43 = math.tanh %42 : vector<2x128xf32>
    %cst_18 = arith.constant 1.000000e+00 : f32
    %44 = vector.broadcast %cst_18 : f32 to vector<2x128xf32>
    %45 = arith.subf %44, %37 : vector<2x128xf32>
    %46 = arith.mulf %45, %43 : vector<2x128xf32>
    %47 = arith.mulf %37, %11 : vector<2x128xf32>
    %48 = arith.addf %46, %47 : vector<2x128xf32>
    %49 = arith.mulf %21, %48 : vector<2x128xf32>
    %c2 = arith.constant 2 : index
    %c0_19 = arith.constant 0 : index
    %50 = vector.load %arg6[%c2, %c0_19] : memref<16x512xf32, #tpu.memory_space<vmem>>, vector<2x512xf32>
    %cst_20 = arith.constant dense<0.000000e+00> : vector<2x512xf32>
    %51 = tpu.matmul %49, %7, %cst_20 {dimension_numbers = #tpu.dot_dimension_numbers<[1], [0], [0], [1], [0, 0, 1, 1], [], []>} : vector<2x128xf32>, vector<128x512xf32>, vector<2x512xf32> -> vector<2x512xf32>
    %52 = vector.extract_strided_slice %50 {offsets = [0, 0], sizes = [2, 128], strides = [1, 1]} : vector<2x512xf32> to vector<2x128xf32>
    %53 = vector.extract_strided_slice %51 {offsets = [0, 0], sizes = [2, 128], strides = [1, 1]} : vector<2x512xf32> to vector<2x128xf32>
    %54 = arith.addf %52, %53 : vector<2x128xf32>
    %55 = arith.negf %54 : vector<2x128xf32>
    %56 = math.exp %55 : vector<2x128xf32>
    %cst_21 = arith.constant 1.000000e+00 : f32
    %57 = vector.broadcast %cst_21 : f32 to vector<2x128xf32>
    %58 = arith.addf %57, %56 : vector<2x128xf32>
    %59 = arith.divf %57, %58 : vector<2x128xf32>
    %60 = vector.extract_strided_slice %50 {offsets = [0, 128], sizes = [2, 128], strides = [1, 1]} : vector<2x512xf32> to vector<2x128xf32>
    %61 = vector.extract_strided_slice %51 {offsets = [0, 128], sizes = [2, 128], strides = [1, 1]} : vector<2x512xf32> to vector<2x128xf32>
    %62 = arith.addf %60, %61 : vector<2x128xf32>
    %63 = arith.negf %62 : vector<2x128xf32>
    %64 = math.exp %63 : vector<2x128xf32>
    %cst_22 = arith.constant 1.000000e+00 : f32
    %65 = vector.broadcast %cst_22 : f32 to vector<2x128xf32>
    %66 = arith.addf %65, %64 : vector<2x128xf32>
    %67 = arith.divf %65, %66 : vector<2x128xf32>
    %68 = vector.extract_strided_slice %50 {offsets = [0, 256], sizes = [2, 128], strides = [1, 1]} : vector<2x512xf32> to vector<2x128xf32>
    %69 = vector.extract_strided_slice %51 {offsets = [0, 256], sizes = [2, 128], strides = [1, 1]} : vector<2x512xf32> to vector<2x128xf32>
    %70 = arith.addf %68, %69 : vector<2x128xf32>
    %71 = arith.negf %70 : vector<2x128xf32>
    %72 = math.exp %71 : vector<2x128xf32>
    %cst_23 = arith.constant 1.000000e+00 : f32
    %73 = vector.broadcast %cst_23 : f32 to vector<2x128xf32>
    %74 = arith.addf %73, %72 : vector<2x128xf32>
    %75 = arith.divf %73, %74 : vector<2x128xf32>
    %76 = vector.extract_strided_slice %50 {offsets = [0, 384], sizes = [2, 128], strides = [1, 1]} : vector<2x512xf32> to vector<2x128xf32>
    %77 = vector.extract_strided_slice %51 {offsets = [0, 384], sizes = [2, 128], strides = [1, 1]} : vector<2x512xf32> to vector<2x128xf32>
    %78 = arith.addf %77, %10 : vector<2x128xf32>
    %79 = arith.mulf %67, %78 : vector<2x128xf32>
    %80 = arith.addf %76, %79 : vector<2x128xf32>
    %81 = math.tanh %80 : vector<2x128xf32>
    %cst_24 = arith.constant 1.000000e+00 : f32
    %82 = vector.broadcast %cst_24 : f32 to vector<2x128xf32>
    %83 = arith.subf %82, %75 : vector<2x128xf32>
    %84 = arith.mulf %83, %81 : vector<2x128xf32>
    %85 = arith.mulf %75, %49 : vector<2x128xf32>
    %86 = arith.addf %84, %85 : vector<2x128xf32>
    %87 = arith.mulf %59, %86 : vector<2x128xf32>
    %c4 = arith.constant 4 : index
    %c0_25 = arith.constant 0 : index
    %88 = vector.load %arg6[%c4, %c0_25] : memref<16x512xf32, #tpu.memory_space<vmem>>, vector<2x512xf32>
    %cst_26 = arith.constant dense<0.000000e+00> : vector<2x512xf32>
    %89 = tpu.matmul %87, %7, %cst_26 {dimension_numbers = #tpu.dot_dimension_numbers<[1], [0], [0], [1], [0, 0, 1, 1], [], []>} : vector<2x128xf32>, vector<128x512xf32>, vector<2x512xf32> -> vector<2x512xf32>
    %90 = vector.extract_strided_slice %88 {offsets = [0, 0], sizes = [2, 128], strides = [1, 1]} : vector<2x512xf32> to vector<2x128xf32>
    %91 = vector.extract_strided_slice %89 {offsets = [0, 0], sizes = [2, 128], strides = [1, 1]} : vector<2x512xf32> to vector<2x128xf32>
    %92 = arith.addf %90, %91 : vector<2x128xf32>
    %93 = arith.negf %92 : vector<2x128xf32>
    %94 = math.exp %93 : vector<2x128xf32>
    %cst_27 = arith.constant 1.000000e+00 : f32
    %95 = vector.broadcast %cst_27 : f32 to vector<2x128xf32>
    %96 = arith.addf %95, %94 : vector<2x128xf32>
    %97 = arith.divf %95, %96 : vector<2x128xf32>
    %98 = vector.extract_strided_slice %88 {offsets = [0, 128], sizes = [2, 128], strides = [1, 1]} : vector<2x512xf32> to vector<2x128xf32>
    %99 = vector.extract_strided_slice %89 {offsets = [0, 128], sizes = [2, 128], strides = [1, 1]} : vector<2x512xf32> to vector<2x128xf32>
    %100 = arith.addf %98, %99 : vector<2x128xf32>
    %101 = arith.negf %100 : vector<2x128xf32>
    %102 = math.exp %101 : vector<2x128xf32>
    %cst_28 = arith.constant 1.000000e+00 : f32
    %103 = vector.broadcast %cst_28 : f32 to vector<2x128xf32>
    %104 = arith.addf %103, %102 : vector<2x128xf32>
    %105 = arith.divf %103, %104 : vector<2x128xf32>
    %106 = vector.extract_strided_slice %88 {offsets = [0, 256], sizes = [2, 128], strides = [1, 1]} : vector<2x512xf32> to vector<2x128xf32>
    %107 = vector.extract_strided_slice %89 {offsets = [0, 256], sizes = [2, 128], strides = [1, 1]} : vector<2x512xf32> to vector<2x128xf32>
    %108 = arith.addf %106, %107 : vector<2x128xf32>
    %109 = arith.negf %108 : vector<2x128xf32>
    %110 = math.exp %109 : vector<2x128xf32>
    %cst_29 = arith.constant 1.000000e+00 : f32
    %111 = vector.broadcast %cst_29 : f32 to vector<2x128xf32>
    %112 = arith.addf %111, %110 : vector<2x128xf32>
    %113 = arith.divf %111, %112 : vector<2x128xf32>
    %114 = vector.extract_strided_slice %88 {offsets = [0, 384], sizes = [2, 128], strides = [1, 1]} : vector<2x512xf32> to vector<2x128xf32>
    %115 = vector.extract_strided_slice %89 {offsets = [0, 384], sizes = [2, 128], strides = [1, 1]} : vector<2x512xf32> to vector<2x128xf32>
    %116 = arith.addf %115, %10 : vector<2x128xf32>
    %117 = arith.mulf %105, %116 : vector<2x128xf32>
    %118 = arith.addf %114, %117 : vector<2x128xf32>
    %119 = math.tanh %118 : vector<2x128xf32>
    %cst_30 = arith.constant 1.000000e+00 : f32
    %120 = vector.broadcast %cst_30 : f32 to vector<2x128xf32>
    %121 = arith.subf %120, %113 : vector<2x128xf32>
    %122 = arith.mulf %121, %119 : vector<2x128xf32>
    %123 = arith.mulf %113, %87 : vector<2x128xf32>
    %124 = arith.addf %122, %123 : vector<2x128xf32>
    %125 = arith.mulf %97, %124 : vector<2x128xf32>
    %c6 = arith.constant 6 : index
    %c0_31 = arith.constant 0 : index
    %126 = vector.load %arg6[%c6, %c0_31] : memref<16x512xf32, #tpu.memory_space<vmem>>, vector<2x512xf32>
    %cst_32 = arith.constant dense<0.000000e+00> : vector<2x512xf32>
    %127 = tpu.matmul %125, %7, %cst_32 {dimension_numbers = #tpu.dot_dimension_numbers<[1], [0], [0], [1], [0, 0, 1, 1], [], []>} : vector<2x128xf32>, vector<128x512xf32>, vector<2x512xf32> -> vector<2x512xf32>
    %128 = vector.extract_strided_slice %126 {offsets = [0, 0], sizes = [2, 128], strides = [1, 1]} : vector<2x512xf32> to vector<2x128xf32>
    %129 = vector.extract_strided_slice %127 {offsets = [0, 0], sizes = [2, 128], strides = [1, 1]} : vector<2x512xf32> to vector<2x128xf32>
    %130 = arith.addf %128, %129 : vector<2x128xf32>
    %131 = arith.negf %130 : vector<2x128xf32>
    %132 = math.exp %131 : vector<2x128xf32>
    %cst_33 = arith.constant 1.000000e+00 : f32
    %133 = vector.broadcast %cst_33 : f32 to vector<2x128xf32>
    %134 = arith.addf %133, %132 : vector<2x128xf32>
    %135 = arith.divf %133, %134 : vector<2x128xf32>
    %136 = vector.extract_strided_slice %126 {offsets = [0, 128], sizes = [2, 128], strides = [1, 1]} : vector<2x512xf32> to vector<2x128xf32>
    %137 = vector.extract_strided_slice %127 {offsets = [0, 128], sizes = [2, 128], strides = [1, 1]} : vector<2x512xf32> to vector<2x128xf32>
    %138 = arith.addf %136, %137 : vector<2x128xf32>
    %139 = arith.negf %138 : vector<2x128xf32>
    %140 = math.exp %139 : vector<2x128xf32>
    %cst_34 = arith.constant 1.000000e+00 : f32
    %141 = vector.broadcast %cst_34 : f32 to vector<2x128xf32>
    %142 = arith.addf %141, %140 : vector<2x128xf32>
    %143 = arith.divf %141, %142 : vector<2x128xf32>
    %144 = vector.extract_strided_slice %126 {offsets = [0, 256], sizes = [2, 128], strides = [1, 1]} : vector<2x512xf32> to vector<2x128xf32>
    %145 = vector.extract_strided_slice %127 {offsets = [0, 256], sizes = [2, 128], strides = [1, 1]} : vector<2x512xf32> to vector<2x128xf32>
    %146 = arith.addf %144, %145 : vector<2x128xf32>
    %147 = arith.negf %146 : vector<2x128xf32>
    %148 = math.exp %147 : vector<2x128xf32>
    %cst_35 = arith.constant 1.000000e+00 : f32
    %149 = vector.broadcast %cst_35 : f32 to vector<2x128xf32>
    %150 = arith.addf %149, %148 : vector<2x128xf32>
    %151 = arith.divf %149, %150 : vector<2x128xf32>
    %152 = vector.extract_strided_slice %126 {offsets = [0, 384], sizes = [2, 128], strides = [1, 1]} : vector<2x512xf32> to vector<2x128xf32>
    %153 = vector.extract_strided_slice %127 {offsets = [0, 384], sizes = [2, 128], strides = [1, 1]} : vector<2x512xf32> to vector<2x128xf32>
    %154 = arith.addf %153, %10 : vector<2x128xf32>
    %155 = arith.mulf %143, %154 : vector<2x128xf32>
    %156 = arith.addf %152, %155 : vector<2x128xf32>
    %157 = math.tanh %156 : vector<2x128xf32>
    %cst_36 = arith.constant 1.000000e+00 : f32
    %158 = vector.broadcast %cst_36 : f32 to vector<2x128xf32>
    %159 = arith.subf %158, %151 : vector<2x128xf32>
    %160 = arith.mulf %159, %157 : vector<2x128xf32>
    %161 = arith.mulf %151, %125 : vector<2x128xf32>
    %162 = arith.addf %160, %161 : vector<2x128xf32>
    %163 = arith.mulf %135, %162 : vector<2x128xf32>
    %c8 = arith.constant 8 : index
    %c0_37 = arith.constant 0 : index
    %164 = vector.load %arg6[%c8, %c0_37] : memref<16x512xf32, #tpu.memory_space<vmem>>, vector<2x512xf32>
    %cst_38 = arith.constant dense<0.000000e+00> : vector<2x512xf32>
    %165 = tpu.matmul %163, %7, %cst_38 {dimension_numbers = #tpu.dot_dimension_numbers<[1], [0], [0], [1], [0, 0, 1, 1], [], []>} : vector<2x128xf32>, vector<128x512xf32>, vector<2x512xf32> -> vector<2x512xf32>
    %166 = vector.extract_strided_slice %164 {offsets = [0, 0], sizes = [2, 128], strides = [1, 1]} : vector<2x512xf32> to vector<2x128xf32>
    %167 = vector.extract_strided_slice %165 {offsets = [0, 0], sizes = [2, 128], strides = [1, 1]} : vector<2x512xf32> to vector<2x128xf32>
    %168 = arith.addf %166, %167 : vector<2x128xf32>
    %169 = arith.negf %168 : vector<2x128xf32>
    %170 = math.exp %169 : vector<2x128xf32>
    %cst_39 = arith.constant 1.000000e+00 : f32
    %171 = vector.broadcast %cst_39 : f32 to vector<2x128xf32>
    %172 = arith.addf %171, %170 : vector<2x128xf32>
    %173 = arith.divf %171, %172 : vector<2x128xf32>
    %174 = vector.extract_strided_slice %164 {offsets = [0, 128], sizes = [2, 128], strides = [1, 1]} : vector<2x512xf32> to vector<2x128xf32>
    %175 = vector.extract_strided_slice %165 {offsets = [0, 128], sizes = [2, 128], strides = [1, 1]} : vector<2x512xf32> to vector<2x128xf32>
    %176 = arith.addf %174, %175 : vector<2x128xf32>
    %177 = arith.negf %176 : vector<2x128xf32>
    %178 = math.exp %177 : vector<2x128xf32>
    %cst_40 = arith.constant 1.000000e+00 : f32
    %179 = vector.broadcast %cst_40 : f32 to vector<2x128xf32>
    %180 = arith.addf %179, %178 : vector<2x128xf32>
    %181 = arith.divf %179, %180 : vector<2x128xf32>
    %182 = vector.extract_strided_slice %164 {offsets = [0, 256], sizes = [2, 128], strides = [1, 1]} : vector<2x512xf32> to vector<2x128xf32>
    %183 = vector.extract_strided_slice %165 {offsets = [0, 256], sizes = [2, 128], strides = [1, 1]} : vector<2x512xf32> to vector<2x128xf32>
    %184 = arith.addf %182, %183 : vector<2x128xf32>
    %185 = arith.negf %184 : vector<2x128xf32>
    %186 = math.exp %185 : vector<2x128xf32>
    %cst_41 = arith.constant 1.000000e+00 : f32
    %187 = vector.broadcast %cst_41 : f32 to vector<2x128xf32>
    %188 = arith.addf %187, %186 : vector<2x128xf32>
    %189 = arith.divf %187, %188 : vector<2x128xf32>
    %190 = vector.extract_strided_slice %164 {offsets = [0, 384], sizes = [2, 128], strides = [1, 1]} : vector<2x512xf32> to vector<2x128xf32>
    %191 = vector.extract_strided_slice %165 {offsets = [0, 384], sizes = [2, 128], strides = [1, 1]} : vector<2x512xf32> to vector<2x128xf32>
    %192 = arith.addf %191, %10 : vector<2x128xf32>
    %193 = arith.mulf %181, %192 : vector<2x128xf32>
    %194 = arith.addf %190, %193 : vector<2x128xf32>
    %195 = math.tanh %194 : vector<2x128xf32>
    %cst_42 = arith.constant 1.000000e+00 : f32
    %196 = vector.broadcast %cst_42 : f32 to vector<2x128xf32>
    %197 = arith.subf %196, %189 : vector<2x128xf32>
    %198 = arith.mulf %197, %195 : vector<2x128xf32>
    %199 = arith.mulf %189, %163 : vector<2x128xf32>
    %200 = arith.addf %198, %199 : vector<2x128xf32>
    %201 = arith.mulf %173, %200 : vector<2x128xf32>
    %c10 = arith.constant 10 : index
    %c0_43 = arith.constant 0 : index
    %202 = vector.load %arg6[%c10, %c0_43] : memref<16x512xf32, #tpu.memory_space<vmem>>, vector<2x512xf32>
    %cst_44 = arith.constant dense<0.000000e+00> : vector<2x512xf32>
    %203 = tpu.matmul %201, %7, %cst_44 {dimension_numbers = #tpu.dot_dimension_numbers<[1], [0], [0], [1], [0, 0, 1, 1], [], []>} : vector<2x128xf32>, vector<128x512xf32>, vector<2x512xf32> -> vector<2x512xf32>
    %204 = vector.extract_strided_slice %202 {offsets = [0, 0], sizes = [2, 128], strides = [1, 1]} : vector<2x512xf32> to vector<2x128xf32>
    %205 = vector.extract_strided_slice %203 {offsets = [0, 0], sizes = [2, 128], strides = [1, 1]} : vector<2x512xf32> to vector<2x128xf32>
    %206 = arith.addf %204, %205 : vector<2x128xf32>
    %207 = arith.negf %206 : vector<2x128xf32>
    %208 = math.exp %207 : vector<2x128xf32>
    %cst_45 = arith.constant 1.000000e+00 : f32
    %209 = vector.broadcast %cst_45 : f32 to vector<2x128xf32>
    %210 = arith.addf %209, %208 : vector<2x128xf32>
    %211 = arith.divf %209, %210 : vector<2x128xf32>
    %212 = vector.extract_strided_slice %202 {offsets = [0, 128], sizes = [2, 128], strides = [1, 1]} : vector<2x512xf32> to vector<2x128xf32>
    %213 = vector.extract_strided_slice %203 {offsets = [0, 128], sizes = [2, 128], strides = [1, 1]} : vector<2x512xf32> to vector<2x128xf32>
    %214 = arith.addf %212, %213 : vector<2x128xf32>
    %215 = arith.negf %214 : vector<2x128xf32>
    %216 = math.exp %215 : vector<2x128xf32>
    %cst_46 = arith.constant 1.000000e+00 : f32
    %217 = vector.broadcast %cst_46 : f32 to vector<2x128xf32>
    %218 = arith.addf %217, %216 : vector<2x128xf32>
    %219 = arith.divf %217, %218 : vector<2x128xf32>
    %220 = vector.extract_strided_slice %202 {offsets = [0, 256], sizes = [2, 128], strides = [1, 1]} : vector<2x512xf32> to vector<2x128xf32>
    %221 = vector.extract_strided_slice %203 {offsets = [0, 256], sizes = [2, 128], strides = [1, 1]} : vector<2x512xf32> to vector<2x128xf32>
    %222 = arith.addf %220, %221 : vector<2x128xf32>
    %223 = arith.negf %222 : vector<2x128xf32>
    %224 = math.exp %223 : vector<2x128xf32>
    %cst_47 = arith.constant 1.000000e+00 : f32
    %225 = vector.broadcast %cst_47 : f32 to vector<2x128xf32>
    %226 = arith.addf %225, %224 : vector<2x128xf32>
    %227 = arith.divf %225, %226 : vector<2x128xf32>
    %228 = vector.extract_strided_slice %202 {offsets = [0, 384], sizes = [2, 128], strides = [1, 1]} : vector<2x512xf32> to vector<2x128xf32>
    %229 = vector.extract_strided_slice %203 {offsets = [0, 384], sizes = [2, 128], strides = [1, 1]} : vector<2x512xf32> to vector<2x128xf32>
    %230 = arith.addf %229, %10 : vector<2x128xf32>
    %231 = arith.mulf %219, %230 : vector<2x128xf32>
    %232 = arith.addf %228, %231 : vector<2x128xf32>
    %233 = math.tanh %232 : vector<2x128xf32>
    %cst_48 = arith.constant 1.000000e+00 : f32
    %234 = vector.broadcast %cst_48 : f32 to vector<2x128xf32>
    %235 = arith.subf %234, %227 : vector<2x128xf32>
    %236 = arith.mulf %235, %233 : vector<2x128xf32>
    %237 = arith.mulf %227, %201 : vector<2x128xf32>
    %238 = arith.addf %236, %237 : vector<2x128xf32>
    %239 = arith.mulf %211, %238 : vector<2x128xf32>
    %c12 = arith.constant 12 : index
    %c0_49 = arith.constant 0 : index
    %240 = vector.load %arg6[%c12, %c0_49] : memref<16x512xf32, #tpu.memory_space<vmem>>, vector<2x512xf32>
    %cst_50 = arith.constant dense<0.000000e+00> : vector<2x512xf32>
    %241 = tpu.matmul %239, %7, %cst_50 {dimension_numbers = #tpu.dot_dimension_numbers<[1], [0], [0], [1], [0, 0, 1, 1], [], []>} : vector<2x128xf32>, vector<128x512xf32>, vector<2x512xf32> -> vector<2x512xf32>
    %242 = vector.extract_strided_slice %240 {offsets = [0, 0], sizes = [2, 128], strides = [1, 1]} : vector<2x512xf32> to vector<2x128xf32>
    %243 = vector.extract_strided_slice %241 {offsets = [0, 0], sizes = [2, 128], strides = [1, 1]} : vector<2x512xf32> to vector<2x128xf32>
    %244 = arith.addf %242, %243 : vector<2x128xf32>
    %245 = arith.negf %244 : vector<2x128xf32>
    %246 = math.exp %245 : vector<2x128xf32>
    %cst_51 = arith.constant 1.000000e+00 : f32
    %247 = vector.broadcast %cst_51 : f32 to vector<2x128xf32>
    %248 = arith.addf %247, %246 : vector<2x128xf32>
    %249 = arith.divf %247, %248 : vector<2x128xf32>
    %250 = vector.extract_strided_slice %240 {offsets = [0, 128], sizes = [2, 128], strides = [1, 1]} : vector<2x512xf32> to vector<2x128xf32>
    %251 = vector.extract_strided_slice %241 {offsets = [0, 128], sizes = [2, 128], strides = [1, 1]} : vector<2x512xf32> to vector<2x128xf32>
    %252 = arith.addf %250, %251 : vector<2x128xf32>
    %253 = arith.negf %252 : vector<2x128xf32>
    %254 = math.exp %253 : vector<2x128xf32>
    %cst_52 = arith.constant 1.000000e+00 : f32
    %255 = vector.broadcast %cst_52 : f32 to vector<2x128xf32>
    %256 = arith.addf %255, %254 : vector<2x128xf32>
    %257 = arith.divf %255, %256 : vector<2x128xf32>
    %258 = vector.extract_strided_slice %240 {offsets = [0, 256], sizes = [2, 128], strides = [1, 1]} : vector<2x512xf32> to vector<2x128xf32>
    %259 = vector.extract_strided_slice %241 {offsets = [0, 256], sizes = [2, 128], strides = [1, 1]} : vector<2x512xf32> to vector<2x128xf32>
    %260 = arith.addf %258, %259 : vector<2x128xf32>
    %261 = arith.negf %260 : vector<2x128xf32>
    %262 = math.exp %261 : vector<2x128xf32>
    %cst_53 = arith.constant 1.000000e+00 : f32
    %263 = vector.broadcast %cst_53 : f32 to vector<2x128xf32>
    %264 = arith.addf %263, %262 : vector<2x128xf32>
    %265 = arith.divf %263, %264 : vector<2x128xf32>
    %266 = vector.extract_strided_slice %240 {offsets = [0, 384], sizes = [2, 128], strides = [1, 1]} : vector<2x512xf32> to vector<2x128xf32>
    %267 = vector.extract_strided_slice %241 {offsets = [0, 384], sizes = [2, 128], strides = [1, 1]} : vector<2x512xf32> to vector<2x128xf32>
    %268 = arith.addf %267, %10 : vector<2x128xf32>
    %269 = arith.mulf %257, %268 : vector<2x128xf32>
    %270 = arith.addf %266, %269 : vector<2x128xf32>
    %271 = math.tanh %270 : vector<2x128xf32>
    %cst_54 = arith.constant 1.000000e+00 : f32
    %272 = vector.broadcast %cst_54 : f32 to vector<2x128xf32>
    %273 = arith.subf %272, %265 : vector<2x128xf32>
    %274 = arith.mulf %273, %271 : vector<2x128xf32>
    %275 = arith.mulf %265, %239 : vector<2x128xf32>
    %276 = arith.addf %274, %275 : vector<2x128xf32>
    %277 = arith.mulf %249, %276 : vector<2x128xf32>
    %c14 = arith.constant 14 : index
    %c0_55 = arith.constant 0 : index
    %278 = vector.load %arg6[%c14, %c0_55] : memref<16x512xf32, #tpu.memory_space<vmem>>, vector<2x512xf32>
    %cst_56 = arith.constant dense<0.000000e+00> : vector<2x512xf32>
    %279 = tpu.matmul %277, %7, %cst_56 {dimension_numbers = #tpu.dot_dimension_numbers<[1], [0], [0], [1], [0, 0, 1, 1], [], []>} : vector<2x128xf32>, vector<128x512xf32>, vector<2x512xf32> -> vector<2x512xf32>
    %280 = vector.extract_strided_slice %278 {offsets = [0, 0], sizes = [2, 128], strides = [1, 1]} : vector<2x512xf32> to vector<2x128xf32>
    %281 = vector.extract_strided_slice %279 {offsets = [0, 0], sizes = [2, 128], strides = [1, 1]} : vector<2x512xf32> to vector<2x128xf32>
    %282 = arith.addf %280, %281 : vector<2x128xf32>
    %283 = arith.negf %282 : vector<2x128xf32>
    %284 = math.exp %283 : vector<2x128xf32>
    %cst_57 = arith.constant 1.000000e+00 : f32
    %285 = vector.broadcast %cst_57 : f32 to vector<2x128xf32>
    %286 = arith.addf %285, %284 : vector<2x128xf32>
    %287 = arith.divf %285, %286 : vector<2x128xf32>
    %288 = vector.extract_strided_slice %278 {offsets = [0, 128], sizes = [2, 128], strides = [1, 1]} : vector<2x512xf32> to vector<2x128xf32>
    %289 = vector.extract_strided_slice %279 {offsets = [0, 128], sizes = [2, 128], strides = [1, 1]} : vector<2x512xf32> to vector<2x128xf32>
    %290 = arith.addf %288, %289 : vector<2x128xf32>
    %291 = arith.negf %290 : vector<2x128xf32>
    %292 = math.exp %291 : vector<2x128xf32>
    %cst_58 = arith.constant 1.000000e+00 : f32
    %293 = vector.broadcast %cst_58 : f32 to vector<2x128xf32>
    %294 = arith.addf %293, %292 : vector<2x128xf32>
    %295 = arith.divf %293, %294 : vector<2x128xf32>
    %296 = vector.extract_strided_slice %278 {offsets = [0, 256], sizes = [2, 128], strides = [1, 1]} : vector<2x512xf32> to vector<2x128xf32>
    %297 = vector.extract_strided_slice %279 {offsets = [0, 256], sizes = [2, 128], strides = [1, 1]} : vector<2x512xf32> to vector<2x128xf32>
    %298 = arith.addf %296, %297 : vector<2x128xf32>
    %299 = arith.negf %298 : vector<2x128xf32>
    %300 = math.exp %299 : vector<2x128xf32>
    %cst_59 = arith.constant 1.000000e+00 : f32
    %301 = vector.broadcast %cst_59 : f32 to vector<2x128xf32>
    %302 = arith.addf %301, %300 : vector<2x128xf32>
    %303 = arith.divf %301, %302 : vector<2x128xf32>
    %304 = vector.extract_strided_slice %278 {offsets = [0, 384], sizes = [2, 128], strides = [1, 1]} : vector<2x512xf32> to vector<2x128xf32>
    %305 = vector.extract_strided_slice %279 {offsets = [0, 384], sizes = [2, 128], strides = [1, 1]} : vector<2x512xf32> to vector<2x128xf32>
    %306 = arith.addf %305, %10 : vector<2x128xf32>
    %307 = arith.mulf %295, %306 : vector<2x128xf32>
    %308 = arith.addf %304, %307 : vector<2x128xf32>
    %309 = math.tanh %308 : vector<2x128xf32>
    %cst_60 = arith.constant 1.000000e+00 : f32
    %310 = vector.broadcast %cst_60 : f32 to vector<2x128xf32>
    %311 = arith.subf %310, %303 : vector<2x128xf32>
    %312 = arith.mulf %311, %309 : vector<2x128xf32>
    %313 = arith.mulf %303, %277 : vector<2x128xf32>
    %314 = arith.addf %312, %313 : vector<2x128xf32>
    %315 = arith.mulf %287, %314 : vector<2x128xf32>
    %c0_61 = arith.constant 0 : index
    %c0_62 = arith.constant 0 : index
    %316 = vector.load %arg5[%c0_61, %c0_62] : memref<2x128xf32, #tpu.memory_space<vmem>>, vector<2x128xf32>
    tpu.vector_store %arg5[%c0_61, %c0_62], %315 {strides = array<i32>} : memref<2x128xf32, #tpu.memory_space<vmem>>, vector<2x128xf32>,
    return
  }
}

</mosaic_0001>

<bundles_post_ra>
// kernel: tpu_custom_call.1
= control target key start
LH: loop header
LB: loop body
LE: loop exit
PB: predicated region body
PF: predicated region fallthrough
CT: control target
= control target key end

     0   :  { %10 = vsyncpa [#allocation4], 0  ;;  %s3109_s0 = inlined_call_operand.hbm [shape: f32[16,16], index: 0, kind: input, shape index: {}]   ;;  %s3110_s1 = inlined_call_operand.hbm [shape: f32[16,512], index: 1, kind: input, shape index: {}]   ;;  %s3111_s2 = inlined_call_operand.hbm [shape: f32[128,512], index: 2, kind: input, shape index: {}]   ;;  %s3112_s3 = inlined_call_operand.vmem [shape: f32[1,512], index: 3, kind: input, shape index: {}]   ;;  %s3113_s4 = inlined_call_operand.vmem [shape: f32[1,128], index: 4, kind: input, shape index: {}]   ;;  %s3114_s5 = inlined_call_operand.hbm [shape: f32[2,128], index: 5, kind: output, shape index: {}]  }
   0x1   :  { %11 = vsyncpa [#allocation7], 0 }
   0x2   :  { %12 = vsyncpa [#allocation5], 0  ;;  %s2625_s18 = smov [#allocation6]   ;;  %s2531_s22 = scalar_lea.hbm %s3110_s1, 1024 }
   0x3   :  { %s30_s19 = sshll.u32 %s2625_s18, 4  ;;  %p2532_p0 = scmp.ne.s32.totalorder %s3110_s1, %s2531_s22  ;;  %s31_s19 = int_to_ptr.vmem [resolvable:$true] %s30_s19 }
   0x4   :  { %p2535_p1 = scmp.lt.u32.totalorder %s2531_s22, %s3110_s1 }
   0x6   :  { %p2537_p2 = pnand %p2535_p1, %p2532_p0 }
   0x8   :  { %2540 = shalt.err (!%p2537_p2)
}
   0x9   :  { %s2541_s27 = scalar_lea.vmem %s31_s19, 1024  ;;  %p2546_p4 = scmp.lt.s32.totalorder %s31_s19, %s31_s19 }
   0xa   :  { %p2542_p3 = scmp.ne.s32.totalorder %s31_s19, %s2541_s27  ;;  %p2547_p5 = scmp.lt.s32.totalorder %s2541_s27, %s2541_s27 }
   0xc   :  { %p2548_p6 = por %p2547_p5, %p2546_p4 }
   0xe   :  { %p2549_p7 = pnand %p2548_p6, %p2542_p3 }
  0x10   :  { %2552 = shalt.err (!%p2549_p7)
}
  0x11   :  { %s2626_s28 = smov 512   ;;  %s2627_s29 = smov 32  }
  0x12   :  { %36 = dma.hbm_to_vmem [thread:$0]  %s3110_s1, 1024, %s31_s19, [#allocation7], %s2626_s28, %s2626_s28, %s2627_s29  }
  0x13   :  { %s2628_s7 = smov [#allocation3]   ;;  %s2553_s11 = scalar_lea.hbm %s3109_s0, 256 }
  0x14   :  { %s18_s8 = sshll.u32 %s2628_s7, 4  ;;  %p2554_p8 = scmp.ne.s32.totalorder %s3109_s0, %s2553_s11  ;;  %s19_s8 = int_to_ptr.vmem [resolvable:$true] %s18_s8 }
  0x15   :  { %p2557_p9 = scmp.lt.u32.totalorder %s2553_s11, %s3109_s0 }
  0x17   :  { %p2559_p10 = pnand %p2557_p9, %p2554_p8 }
  0x19   :  { %2562 = shalt.err (!%p2559_p10)
}
  0x1a   :  { %s2563_s16 = scalar_lea.vmem %s19_s8, 256  ;;  %p2568_p12 = scmp.lt.s32.totalorder %s19_s8, %s19_s8 }
  0x1b   :  { %p2564_p11 = scmp.ne.s32.totalorder %s19_s8, %s2563_s16  ;;  %p2569_p13 = scmp.lt.s32.totalorder %s2563_s16, %s2563_s16 }
  0x1d   :  { %p2570_p0 = por %p2569_p13, %p2568_p12 }
  0x1f   :  { %p2571_p1 = pnand %p2570_p0, %p2564_p11 }
  0x21   :  { %2574 = shalt.err (!%p2571_p1)
}
  0x22   :  { %s2629_s1 = smov 128   ;;  %s2630_s17 = smov 8  }
  0x23   :  { %24 = dma.hbm_to_vmem [thread:$0]  %s3109_s0, 256, %s19_s8, [#allocation4], %s2629_s1, %s2629_s1, %s2630_s17  }
  0x24   :  { %s2631_s20 = smov [#allocation8]   ;;  %s2575_s24 = scalar_lea.hbm %s3111_s2, 8192 }
  0x25   :  { %s42_s21 = sshll.u32 %s2631_s20, 4  ;;  %p2576_p2 = scmp.ne.s32.totalorder %s3111_s2, %s2575_s24  ;;  %s43_s21 = int_to_ptr.vmem [resolvable:$true] %s42_s21 }
  0x26   :  { %p2579_p3 = scmp.lt.u32.totalorder %s2575_s24, %s3111_s2 }
  0x28   :  { %p2581_p4 = pnand %p2579_p3, %p2576_p2 }
  0x2a   :  { %2584 = shalt.err (!%p2581_p4)
}
  0x2b   :  { %s2585_s6 = scalar_lea.vmem %s43_s21, 8192  ;;  %p2590_p6 = scmp.lt.s32.totalorder %s43_s21, %s43_s21 }
  0x2c   :  { %p2586_p5 = scmp.ne.s32.totalorder %s43_s21, %s2585_s6  ;;  %p2591_p7 = scmp.lt.s32.totalorder %s2585_s6, %s2585_s6 }
  0x2e   :  { %p2592_p8 = por %p2591_p7, %p2590_p6 }
  0x30   :  { %p2593_p9 = pnand %p2592_p8, %p2586_p5 }
  0x32   :  { %2596 = shalt.err (!%p2593_p9)
}
  0x33   :  { %48 = dma.hbm_to_vmem [thread:$0]  %s3111_s2, 8192, %s43_s21, [#allocation7], %s2626_s28, %s2626_s28, %s2627_s29  }
  0x34   :  { %2619 = dma.done.wait [#allocation4], 256  }
  0x35   :  { %2620 = vsyncadd [#allocation4], 4294967040 }
  0x36   :  { %2621 = dma.done.wait [#allocation7], 9216  }
  0x37   :  { %2622 = vsyncadd [#allocation7], 4294958080  ;;  %v2632_v0 = vmov 0.0   ;;  %v65_v1 = vld [vmem:[#allocation6 + $0x8] sm:$0xff]  ;;  %v67_v3 = vld [vmem:[#allocation6 + $0x18] sm:$0xff]  ;;  %vm94_vm0 = vcmask 130048  }
  0x38   :  { %165 = vmatprep.mubr.f32.mxu0 %v2632_v0  ;;  %242 = vmatprep.mubr.f32.mxu1 %v2632_v0  ;;  %v69_v2 = vld [vmem:[#allocation6 + $0x28] sm:$0xff]  ;;  %v71_v5 = vld [vmem:[#allocation6 + $0x38] sm:$0xff]  ;;  %v64_v6 = vld [vmem:[#allocation6] sm:$0xff]  ;;  %s2633_s10 = smov [#allocation9]  }
  0x39   :  { %v1889_v4 = vpack.c.bf16 %v69_v2, %v65_v1  ;;  %v68_v7 = vld [vmem:[#allocation6 + $0x20] sm:$0xff]  ;;  %v1893_v8 = vpack.c.bf16 %v71_v5, %v67_v3  ;;  %v66_v10 = vld [vmem:[#allocation6 + $0x10] sm:$0xff]  ;;  %v264_v14 = vld [vmem:[#allocation8 + $0x8] sm:$0xff]  ;;  %s1850_s11 = sshll.u32 %s2633_s10, 4  ;;  %s1851_s11 = int_to_ptr.vmem [resolvable:$true] %s1850_s11 }
  0x3a   :  { %v1891_v9 = vpack.c.bf16 %v68_v7, %v64_v6  ;;  %v70_v11 = vld [vmem:[#allocation6 + $0x30] sm:$0xff]  ;;  %v268_v15 = vld [vmem:[#allocation8 + $0x28] sm:$0xff]  ;;  %v266_v16 = vld [vmem:[#allocation8 + $0x18] sm:$0xff]  ;;  %p2602_p11 = scmp.lt.s32.totalorder %s1851_s11, %s1851_s11 }
  0x3b   :  { %v62_v12 = vld [vmem:[#allocation3] sm:$0xff]  ;;  %1890 = vmatprep.subr.bf16.mxu0 %v1889_v4  ;;  %v1895_v13 = vpack.c.bf16 %v70_v11, %v66_v10  ;;  %1894 = vmatprep.subr.bf16.mxu1 %v1893_v8  ;;  %v2708_v17 = vpack.c.bf16 %v268_v15, %v264_v14  ;;  %v270_v18 = vld [vmem:[#allocation8 + $0x38] sm:$0xff]  ;;  %v263_v19 = vld [vmem:[#allocation8] sm:$0xff] }
  0x3c   :  { %1892 = vmatpush1.bf16.msra.mxu0 %v1891_v9  ;;  %v267_v20 = vld [vmem:[#allocation8 + $0x20] sm:$0xff]  ;;  %v2710_v21 = vpack.c.bf16 %v270_v18, %v266_v16  ;;  %v265_v23 = vld [vmem:[#allocation8 + $0x10] sm:$0xff]  ;;  %v272_v25 = vld [vmem:[#allocation8 + $0x48] sm:$0xff] }
  0x3d   :  { %1896 = vmatpush1.bf16.msra.mxu1 %v1895_v13  ;;  %v2712_v22 = vpack.c.bf16 %v267_v20, %v263_v19  ;;  %v269_v24 = vld [vmem:[#allocation8 + $0x30] sm:$0xff]  ;;  %1898 = vmatprep.subr.bf16.mxu0 %v2708_v17  ;;  %v276_v27 = vld [vmem:[#allocation8 + $0x68] sm:$0xff]  ;;  %v274_v28 = vld [vmem:[#allocation8 + $0x58] sm:$0xff] }
  0x3e   :  { %v2715_v26 = vpack.c.bf16 %v269_v24, %v265_v23  ;;  %v278_v29 = vld [vmem:[#allocation8 + $0x78] sm:$0xff]  ;;  %1930 = vmatprep.subr.bf16.mxu1 %v2710_v21  ;;  %v2719_v30 = vpack.c.bf16 %v276_v27, %v272_v25  ;;  %v271_v32 = vld [vmem:[#allocation8 + $0x40] sm:$0xff]  ;;  %v273_v34 = vld [vmem:[#allocation8 + $0x50] sm:$0xff] }
  0x3f   :  { %1860 = vmatmul.mubr.msk.f32.vlgmr.msra.gmra.mrb[0].mxu0 %vm94_vm0, %v62_v12  ;;  %v2721_v31 = vpack.c.bf16 %v278_v29, %v274_v28  ;;  %v275_v33 = vld [vmem:[#allocation8 + $0x60] sm:$0xff]  ;;  %v277_v36 = vld [vmem:[#allocation8 + $0x70] sm:$0xff]  ;;  %v280_v37 = vld [vmem:[#allocation8 + $0x88] sm:$0xff] }
  0x40   :  { %1862 = vmatmul.mubr.msk.f32.vlgmr.msra.gmra.mrb[0].mxu1 %vm94_vm0, %v62_v12  ;;  %1900 = vmatpush1.bf16.msra.mxu0 %v2712_v22  ;;  %v2725_v35 = vpack.c.bf16 %v275_v33, %v271_v32  ;;  %v284_v38 = vld [vmem:[#allocation8 + $0xa8] sm:$0xff]  ;;  %v2729_v39 = vpack.c.bf16 %v277_v36, %v273_v34  ;;  %v282_v41 = vld [vmem:[#allocation8 + $0x98] sm:$0xff]  ;;  %v279_v43 = vld [vmem:[#allocation8 + $0x80] sm:$0xff] }
  0x41   :  { %1932 = vmatpush1.bf16.msra.mxu1 %v2715_v26  ;;  %1902 = vmatprep.subr.bf16.mxu0 %v2719_v30  ;;  %v2731_v40 = vpack.c.bf16 %v284_v38, %v280_v37  ;;  %v286_v42 = vld [vmem:[#allocation8 + $0xb8] sm:$0xff]  ;;  %v283_v45 = vld [vmem:[#allocation8 + $0xa0] sm:$0xff]  ;;  %v281_v46 = vld [vmem:[#allocation8 + $0x90] sm:$0xff] }
  0x42   :  { %1934 = vmatprep.subr.bf16.mxu1 %v2721_v31  ;;  %v2734_v44 = vpack.c.bf16 %v286_v42, %v282_v41  ;;  %v285_v47 = vld [vmem:[#allocation8 + $0xb0] sm:$0xff]  ;;  %171 = vmatprep.mubr.f32.mxu0 %v2632_v0  ;;  %v288_v48 = vld [vmem:[#allocation8 + $0xc8] sm:$0xff]  ;;  %v290_v50 = vld [vmem:[#allocation8 + $0xd8] sm:$0xff]  ;;  %v2739_v51 = vpack.c.bf16 %v283_v45, %v279_v43 }
  0x43   :  { %v292_v49 = vld [vmem:[#allocation8 + $0xe8] sm:$0xff]  ;;  %248 = vmatprep.mubr.f32.mxu1 %v2632_v0  ;;  %v294_v52 = vld [vmem:[#allocation8 + $0xf8] sm:$0xff]  ;;  %v2743_v53 = vpack.c.bf16 %v285_v47, %v281_v46  ;;  %v287_v55 = vld [vmem:[#allocation8 + $0xc0] sm:$0xff] }
  0x44   :  { %1904 = vmatpush1.bf16.msra.mxu0 %v2725_v35  ;;  %v2745_v54 = vpack.c.bf16 %v292_v49, %v288_v48  ;;  %v291_v56 = vld [vmem:[#allocation8 + $0xe0] sm:$0xff]  ;;  %v289_v57 = vld [vmem:[#allocation8 + $0xd0] sm:$0xff]  ;;  %v2748_v58 = vpack.c.bf16 %v294_v52, %v290_v50  ;;  %v296_v60 = vld [vmem:[#allocation8 + $0x108] sm:$0xff] }
  0x45   :  { %1936 = vmatpush1.bf16.msra.mxu1 %v2729_v39  ;;  %1906 = vmatprep.subr.bf16.mxu0 %v2731_v40  ;;  %v293_v59 = vld [vmem:[#allocation8 + $0xf0] sm:$0xff]  ;;  %v300_v61 = vld [vmem:[#allocation8 + $0x128] sm:$0xff]  ;;  %v298_v62 = vld [vmem:[#allocation8 + $0x118] sm:$0xff]  ;;  %v2751_v1 = vpack.c.bf16 %v291_v56, %v287_v55 }
  0x46   :  { %1938 = vmatprep.subr.bf16.mxu1 %v2734_v44  ;;  %v302_v63 = vld [vmem:[#allocation8 + $0x138] sm:$0xff]  ;;  %v2755_v2 = vpack.c.bf16 %v293_v59, %v289_v57  ;;  %v2757_v3 = vpack.c.bf16 %v300_v61, %v296_v60  ;;  %v295_v4 = vld [vmem:[#allocation8 + $0x100] sm:$0xff]  ;;  %v297_v6 = vld [vmem:[#allocation8 + $0x110] sm:$0xff] }
  0x47   :  { %v299_v5 = vld [vmem:[#allocation8 + $0x120] sm:$0xff]  ;;  %v2760_v7 = vpack.c.bf16 %v302_v63, %v298_v62  ;;  %v301_v8 = vld [vmem:[#allocation8 + $0x130] sm:$0xff]  ;;  %v304_v9 = vld [vmem:[#allocation8 + $0x148] sm:$0xff]  ;;  %v74_v62 = vlaneseq }
  0x48   :  { %1908 = vmatpush1.bf16.msra.mxu0 %v2739_v51  ;;  %v308_v10 = vld [vmem:[#allocation8 + $0x168] sm:$0xff]  ;;  %v306_v11 = vld [vmem:[#allocation8 + $0x158] sm:$0xff]  ;;  %v2763_v13 = vpack.c.bf16 %v299_v5, %v295_v4  ;;  %v303_v14 = vld [vmem:[#allocation8 + $0x140] sm:$0xff]  ;;  %v2767_v15 = vpack.c.bf16 %v301_v8, %v297_v6 }
  0x49   :  { %1940 = vmatpush1.bf16.msra.mxu1 %v2743_v53  ;;  %1910 = vmatprep.subr.bf16.mxu0 %v2745_v54  ;;  %v310_v12 = vld [vmem:[#allocation8 + $0x178] sm:$0xff]  ;;  %v2769_v16 = vpack.c.bf16 %v308_v10, %v304_v9  ;;  %v307_v18 = vld [vmem:[#allocation8 + $0x160] sm:$0xff]  ;;  %v305_v19 = vld [vmem:[#allocation8 + $0x150] sm:$0xff]  ;;  %v75_v63 = vshrl.u32 %v74_v62, 7 }
  0x4a   :  { %1942 = vmatprep.subr.bf16.mxu1 %v2748_v58  ;;  %v63_v20 = vld [vmem:[#allocation3 + $0x8] sm:$0xff]  ;;  %v2772_v23 = vpack.c.bf16 %v310_v12, %v306_v11  ;;  %v309_v24 = vld [vmem:[#allocation8 + $0x170] sm:$0xff]  ;;  %v312_v25 = vld [vmem:[#allocation8 + $0x188] sm:$0xff]  ;;  %v2778_v32 = vpack.c.bf16 %v307_v18, %v303_v14 }
  0x4b   :  { %v316_v27 = vld [vmem:[#allocation8 + $0x1a8] sm:$0xff]  ;;  %1861 = vmatmul.mubr.msk.f32.gmra.mrb[2].mxu0 %vm94_vm0, %v63_v20  ;;  %v314_v28 = vld [vmem:[#allocation8 + $0x198] sm:$0xff]  ;;  %1863 = vmatmul.mubr.msk.f32.gmra.mrb[2].mxu1 %vm94_vm0, %v63_v20  ;;  %v2783_v33 = vpack.c.bf16 %v309_v24, %v305_v19  ;;  %v311_v36 = vld [vmem:[#allocation8 + $0x180] sm:$0xff]  ;;  %v76_v4 = vsub.s32 0, %v75_v63  ;;  %v80_v6 = vsub.s32 1, %v75_v63  ;;  %v84_v8 = vsub.s32 2, %v75_v63 }
  0x4c   :  { %1912 = vmatpush1.bf16.msra.mxu0 %v2751_v1  ;;  %v318_v29 = vld [vmem:[#allocation8 + $0x1b8] sm:$0xff]  ;;  %402 = vmatprep.mubr.f32.mxu0 %v2632_v0  ;;  %v2785_v34 = vpack.c.bf16 %v316_v27, %v312_v25  ;;  %v315_v37 = vld [vmem:[#allocation8 + $0x1a0] sm:$0xff]  ;;  %v313_v38 = vld [vmem:[#allocation8 + $0x190] sm:$0xff]  ;;  %v88_v9 = vsub.s32 3, %v75_v63 }
  0x4d   :  { %1944 = vmatpush1.bf16.msra.mxu1 %v2755_v2  ;;  %1914 = vmatprep.subr.bf16.mxu0 %v2757_v3  ;;  %v2788_v41 = vpack.c.bf16 %v318_v29, %v314_v28  ;;  %v317_v42 = vld [vmem:[#allocation8 + $0x1b0] sm:$0xff]  ;;  %v320_v43 = vld [vmem:[#allocation8 + $0x1c8] sm:$0xff]  ;;  %v322_v46 = vld [vmem:[#allocation8 + $0x1d8] sm:$0xff]  ;;  %v2791_v48 = vpack.c.bf16 %v315_v37, %v311_v36 }
  0x4e   :  { %1946 = vmatprep.subr.bf16.mxu1 %v2760_v7  ;;  %473 = vmatprep.mubr.f32.mxu1 %v2632_v0  ;;  %v324_v45 = vld [vmem:[#allocation8 + $0x1e8] sm:$0xff]  ;;  %v326_v47 = vld [vmem:[#allocation8 + $0x1f8] sm:$0xff]  ;;  %v2795_v49 = vpack.c.bf16 %v317_v42, %v313_v38  ;;  %v319_v52 = vld [vmem:[#allocation8 + $0x1c0] sm:$0xff] }
  0x4f   :  { %v2797_v50 = vpack.c.bf16 %v324_v45, %v320_v43  ;;  %v323_v55 = vld [vmem:[#allocation8 + $0x1e0] sm:$0xff]  ;;  %v2800_v56 = vpack.c.bf16 %v326_v47, %v322_v46  ;;  %v321_v57 = vld [vmem:[#allocation8 + $0x1d0] sm:$0xff] }
  0x50   :  { %1916 = vmatpush1.bf16.msra.mxu0 %v2763_v13  ;;  %v325_v59 = vld [vmem:[#allocation8 + $0x1f0] sm:$0xff]  ;;  %v2803_v60 = vpack.c.bf16 %v323_v55, %v319_v52 }
  0x51   :  { %1948 = vmatpush1.bf16.msra.mxu1 %v2767_v15  ;;  %1918 = vmatprep.subr.bf16.mxu0 %v2769_v16  ;;  %v2807_v61 = vpack.c.bf16 %v325_v59, %v321_v57  ;;  %v72_v5 = vld [vmem:[%s3112_s3] sm:$0xf] }
  0x52   :  { %1950 = vmatprep.subr.bf16.mxu1 %v2772_v23  ;;  %v77_v10 = vrot.slane %v72_v5, %v76_v4  ;;  %v81_v11 = vrot.slane %v72_v5, %v80_v6  ;;  %v85_v12 = vrot.slane %v72_v5, %v84_v8  ;;  %v89_v14 = vrot.slane %v72_v5, %v88_v9 }
  0x54   :  { %1920 = vmatpush1.bf16.msra.mxu0 %v2778_v32 }
  0x55   :  { %1952 = vmatpush1.bf16.msra.mxu1 %v2783_v33  ;;  %1922 = vmatprep.subr.bf16.mxu0 %v2785_v34 }
  0x56   :  { %1954 = vmatprep.subr.bf16.mxu1 %v2788_v41 }
  0x58   :  { %1924 = vmatpush1.bf16.msra.mxu0 %v2791_v48 }
  0x59   :  { %1956 = vmatpush1.bf16.msra.mxu1 %v2795_v49  ;;  %1926 = vmatprep.subr.bf16.mxu0 %v2797_v50 }
  0x5a   :  { %1958 = vmatprep.subr.bf16.mxu1 %v2800_v56 }
  0x5c   :  { %1928 = vmatpush1.bf16.msra.mxu0 %v2803_v60 }
  0x5d   :  { %1960 = vmatpush1.bf16.msra.mxu1 %v2807_v61  ;;  %1962 = vmatprep.subr.bf16.mxu0 %v2708_v17 }
  0x5e   :  { %1994 = vmatprep.subr.bf16.mxu1 %v2710_v21 }
  0x5f   :  { %403 = vmatmul.mubr.f32.vlgmr.msra.gmra.mrb[4].mxu0 %v2632_v0 }
  0x60   :  { %474 = vmatmul.mubr.f32.vlgmr.msra.gmra.mrb[4].mxu1 %v2632_v0  ;;  %1964 = vmatpush1.bf16.msra.mxu0 %v2712_v22 }
  0x61   :  { %1996 = vmatpush1.bf16.msra.mxu1 %v2715_v26  ;;  %1966 = vmatprep.subr.bf16.mxu0 %v2719_v30 }
  0x62   :  { %1998 = vmatprep.subr.bf16.mxu1 %v2721_v31  ;;  %578 = vmatprep.mubr.f32.mxu0 %v2632_v0 }
  0x63   :  { %649 = vmatprep.mubr.f32.mxu1 %v2632_v0 }
  0x64   :  { %1968 = vmatpush1.bf16.msra.mxu0 %v2725_v35 }
  0x65   :  { %2000 = vmatpush1.bf16.msra.mxu1 %v2729_v39  ;;  %1970 = vmatprep.subr.bf16.mxu0 %v2731_v40 }
  0x66   :  { %2002 = vmatprep.subr.bf16.mxu1 %v2734_v44 }
  0x68   :  { %1972 = vmatpush1.bf16.msra.mxu0 %v2739_v51 }
  0x69   :  { %2004 = vmatpush1.bf16.msra.mxu1 %v2743_v53  ;;  %1974 = vmatprep.subr.bf16.mxu0 %v2745_v54 }
  0x6a   :  { %2006 = vmatprep.subr.bf16.mxu1 %v2748_v58 }
  0x6c   :  { %1976 = vmatpush1.bf16.msra.mxu0 %v2751_v1 }
  0x6d   :  { %2008 = vmatpush1.bf16.msra.mxu1 %v2755_v2  ;;  %1978 = vmatprep.subr.bf16.mxu0 %v2757_v3 }
  0x6e   :  { %2010 = vmatprep.subr.bf16.mxu1 %v2760_v7 }
  0x70   :  { %1980 = vmatpush1.bf16.msra.mxu0 %v2763_v13 }
  0x71   :  { %2012 = vmatpush1.bf16.msra.mxu1 %v2767_v15  ;;  %1982 = vmatprep.subr.bf16.mxu0 %v2769_v16 }
  0x72   :  { %2014 = vmatprep.subr.bf16.mxu1 %v2772_v23 }
  0x74   :  { %1984 = vmatpush1.bf16.msra.mxu0 %v2778_v32 }
  0x75   :  { %2016 = vmatpush1.bf16.msra.mxu1 %v2783_v33  ;;  %1986 = vmatprep.subr.bf16.mxu0 %v2785_v34 }
  0x76   :  { %2018 = vmatprep.subr.bf16.mxu1 %v2788_v41 }
  0x78   :  { %1988 = vmatpush1.bf16.msra.mxu0 %v2791_v48 }
  0x79   :  { %2020 = vmatpush1.bf16.msra.mxu1 %v2795_v49  ;;  %1990 = vmatprep.subr.bf16.mxu0 %v2797_v50 }
  0x7a   :  { %2022 = vmatprep.subr.bf16.mxu1 %v2800_v56 }
  0x7c   :  { %1992 = vmatpush1.bf16.msra.mxu0 %v2803_v60 }
  0x7d   :  { %2024 = vmatpush1.bf16.msra.mxu1 %v2807_v61  ;;  %2026 = vmatprep.subr.bf16.mxu0 %v2708_v17 }
  0x7e   :  { %2058 = vmatprep.subr.bf16.mxu1 %v2710_v21 }
 0x112   :  { %v167_v18 = vpop.f32.mrb[0].mxu0 }
 0x113   :  { %v168_v19 = vadd.f32 %v167_v18, %v77_v10  ;;  %v169_v20 = vpop.f32.mrb[1].mxu0  ;;  %v244_v24 = vpop.f32.mrb[0].mxu1 }
 0x114   :  { %v170_v25 = vadd.f32 %v169_v20, %v81_v11  ;;  %v245_v27 = vadd.f32 %v244_v24, %v85_v12  ;;  %v246_v28 = vpop.f32.mrb[1].mxu1 }
 0x115   :  { %255 = vst [vmem:[#allocation2] sm:$0xff] %v168_v19  ;;  %v247_v29 = vadd.f32 %v246_v28, %v89_v14  ;;  %v2856_v19 = vld [vmem:[%s3113_s4] ss:$0 sm:$0xff] }
 0x116   :  { %256 = vst [vmem:[#allocation2 + $0x8] sm:$0xff] %v170_v25  ;;  %257 = vst [vmem:[#allocation2 + $0x10] sm:$0xff] %v245_v27 }
 0x117   :  { %258 = vst [vmem:[#allocation2 + $0x18] sm:$0xff] %v247_v29 }
 0x11c   :  { %v334_v9 = vld [vmem:[#allocation2] sm:$0x3] }
 0x11d   :  { %v335_v57 = vld [vmem:[#allocation2 + $0x8] sm:$0x3]  ;;  %v336_v5 = vld [vmem:[#allocation2 + $0x10] sm:$0x3] }
 0x11e   :  { %v173_v36 = vpop.f32.mrb[2].mxu0  ;;  %v250_v42 = vpop.f32.mrb[2].mxu1  ;;  %v337_v29 = vld [vmem:[#allocation2 + $0x18] sm:$0x3] }
 0x11f   :  { %v174_v37 = vadd.f32 %v173_v36, %v77_v10  ;;  %v175_v38 = vpop.f32.mrb[3].mxu0  ;;  %v251_v45 = vadd.f32 %v250_v42, %v85_v12  ;;  %v252_v46 = vpop.f32.mrb[3].mxu1 }
 0x120   :  { %v176_v43 = vadd.f32 %v175_v38, %v81_v11  ;;  %v253_v47 = vadd.f32 %v252_v46, %v89_v14 }
 0x121   :  { %259 = vst [vmem:[#allocation2 + $0x20] sm:$0xff] %v174_v37  ;;  %261 = vst [vmem:[#allocation2 + $0x30] sm:$0xff] %v251_v45 }
 0x122   :  { %260 = vst [vmem:[#allocation2 + $0x28] sm:$0xff] %v176_v43  ;;  %262 = vst [vmem:[#allocation2 + $0x38] sm:$0xff] %v253_v47 }
 0x132   :  { %v404_v52 = vpop.f32.mrb[4].mxu0 }
 0x133   :  { %v475_v55 = vpop.f32.mrb[4].mxu1  ;;  %v406_v59 = vpop.f32.mrb[5].mxu0  ;;  %v480_v10 = vadd.f32 %v404_v52, %v334_v9  ;;  %v511_v9 = vld [vmem:[#allocation2 + $0x8] sm:$0xc] }
 0x134   :  { %v487_v62 = vadd.f32 %v406_v59, %v335_v57  ;;  %v477_v63 = vpop.f32.mrb[5].mxu1  ;;  %v494_v6 = vadd.f32 %v475_v55, %v336_v5  ;;  %v512_v5 = vld [vmem:[#allocation2 + $0x10] sm:$0xc] }
 0x135   :  { %v1865_v12 = vmul.f32 -1.442695, %v480_v10  ;;  %v501_v24 = vadd.f32 %v2856_v19, %v477_v63 }
 0x136   :  { %v1866_v4 = vmul.f32 -1.442695, %v487_v62  ;;  %v1867_v8 = vmul.f32 -1.442695, %v494_v6 }
 0x138   :  { %2418 = vpow2.f32 %v1866_v4 }
 0x139   :  { %2420 = vpow2.f32 %v1867_v8 }
 0x142   :  { %v2419_v11 = vpop.eup %2418 }
 0x143   :  { %v491_v14 = vadd.f32 1.0, %v2419_v11  ;;  %v2421_v18 = vpop.eup %2420 }
 0x144   :  { %v498_v20 = vadd.f32 1.0, %v2421_v18  ;;  %v510_v18 = vld [vmem:[#allocation2] sm:$0xc] }
 0x145   :  { %2422 = vrcp.f32 %v491_v14 }
 0x146   :  { %2424 = vpow2.f32 %v1865_v12 }
 0x147   :  { %2426 = vrcp.f32 %v498_v20 }
 0x14f   :  { %v2423_v25 = vpop.eup %2422 }
 0x150   :  { %v502_v27 = vmul.f32 %v2423_v25, %v501_v24  ;;  %v2425_v28 = vpop.eup %2424 }
 0x151   :  { %v484_v37 = vadd.f32 1.0, %v2425_v28  ;;  %v2427_v38 = vpop.eup %2426 }
 0x152   :  { %v503_v36 = vadd.f32 %v502_v27, %v337_v29  ;;  %v505_v42 = vsub.f32 1.0, %v2427_v38  ;;  %v507_v46 = vmul.f32 0.0, %v2427_v38 }
 0x154   :  { %2428 = vtanh.f32 %v503_v36 }
 0x155   :  { %2430 = vrcp.f32 %v484_v37 }
 0x15e   :  { %v2429_v43 = vpop.eup %2428 }
 0x15f   :  { %v506_v45 = vmul.f32 %v2429_v43, %v505_v42  ;;  %v2431_v52 = vpop.eup %2430 }
 0x161   :  { %v508_v47 = vadd.f32 %v507_v46, %v506_v45 }
 0x163   :  { %v2859_v55 = vmul.f32 %v2431_v52, %v508_v47  ;;  %v513_v52 = vld [vmem:[#allocation2 + $0x18] sm:$0xc] }
 0x165   :  { %579 = vmatmul.mubr.f32.vlgmr.msra.gmra.mrb[6].mxu0 %v2859_v55  ;;  %650 = vmatmul.mubr.f32.vlgmr.msra.gmra.mrb[6].mxu1 %v2859_v55  ;;  %v696_v37 = vrot.slane %v2859_v55, 6 }
 0x166   :  { %2028 = vmatpush1.bf16.msra.mxu0 %v2712_v22  ;;  %2060 = vmatpush1.bf16.msra.mxu1 %v2715_v26 }
 0x167   :  { %2030 = vmatprep.subr.bf16.mxu0 %v2719_v30  ;;  %2062 = vmatprep.subr.bf16.mxu1 %v2721_v31 }
 0x168   :  { %772 = vmatprep.mubr.f32.mxu0 %v2632_v0  ;;  %843 = vmatprep.mubr.f32.mxu1 %v2632_v0 }
 0x16a   :  { %2032 = vmatpush1.bf16.msra.mxu0 %v2725_v35  ;;  %2064 = vmatpush1.bf16.msra.mxu1 %v2729_v39 }
 0x16b   :  { %2034 = vmatprep.subr.bf16.mxu0 %v2731_v40  ;;  %2066 = vmatprep.subr.bf16.mxu1 %v2734_v44 }
 0x16e   :  { %2036 = vmatpush1.bf16.msra.mxu0 %v2739_v51  ;;  %2068 = vmatpush1.bf16.msra.mxu1 %v2743_v53 }
 0x16f   :  { %2038 = vmatprep.subr.bf16.mxu0 %v2745_v54  ;;  %2070 = vmatprep.subr.bf16.mxu1 %v2748_v58 }
 0x172   :  { %2040 = vmatpush1.bf16.msra.mxu0 %v2751_v1  ;;  %2072 = vmatpush1.bf16.msra.mxu1 %v2755_v2 }
 0x173   :  { %2042 = vmatprep.subr.bf16.mxu0 %v2757_v3  ;;  %2074 = vmatprep.subr.bf16.mxu1 %v2760_v7 }
 0x176   :  { %2044 = vmatpush1.bf16.msra.mxu0 %v2763_v13  ;;  %2076 = vmatpush1.bf16.msra.mxu1 %v2767_v15 }
 0x177   :  { %2046 = vmatprep.subr.bf16.mxu0 %v2769_v16  ;;  %2078 = vmatprep.subr.bf16.mxu1 %v2772_v23 }
 0x17a   :  { %2048 = vmatpush1.bf16.msra.mxu0 %v2778_v32  ;;  %2080 = vmatpush1.bf16.msra.mxu1 %v2783_v33 }
 0x17b   :  { %2050 = vmatprep.subr.bf16.mxu0 %v2785_v34  ;;  %2082 = vmatprep.subr.bf16.mxu1 %v2788_v41 }
 0x17e   :  { %2052 = vmatpush1.bf16.msra.mxu0 %v2791_v48  ;;  %2084 = vmatpush1.bf16.msra.mxu1 %v2795_v49 }
 0x17f   :  { %2054 = vmatprep.subr.bf16.mxu0 %v2797_v50  ;;  %2086 = vmatprep.subr.bf16.mxu1 %v2800_v56 }
 0x182   :  { %2056 = vmatpush1.bf16.msra.mxu0 %v2803_v60  ;;  %2088 = vmatpush1.bf16.msra.mxu1 %v2807_v61 }
 0x183   :  { %2090 = vmatprep.subr.bf16.mxu0 %v2708_v17  ;;  %2122 = vmatprep.subr.bf16.mxu1 %v2710_v21 }
 0x238   :  { %v580_v57 = vpop.f32.mrb[6].mxu0  ;;  %v651_v59 = vpop.f32.mrb[6].mxu1 }
 0x239   :  { %v677_v62 = vrot.slane %v651_v59, 6  ;;  %v582_v63 = vpop.f32.mrb[7].mxu0  ;;  %v653_v4 = vpop.f32.mrb[7].mxu1  ;;  %v657_v14 = vrot.slane %v580_v57, 6 }
 0x23a   :  { %v667_v6 = vrot.slane %v582_v63, 6  ;;  %v686_v36 = vadd.f32 %v2856_v19, %v653_v4 }
 0x23b   :  { %v679_v8 = vadd.f32 %v677_v62, %v512_v5  ;;  %v659_v20 = vadd.f32 %v657_v14, %v510_v18  ;;  %v703_v18 = vld [vmem:[#allocation2 + $0x10] sm:$0x30] }
 0x23c   :  { %v669_v10 = vadd.f32 %v667_v6, %v511_v9  ;;  %v688_v42 = vrot.slane %v686_v36, 6 }
 0x23d   :  { %v1870_v11 = vmul.f32 -1.442695, %v679_v8  ;;  %v1868_v28 = vmul.f32 -1.442695, %v659_v20 }
 0x23e   :  { %v1869_v12 = vmul.f32 -1.442695, %v669_v10 }
 0x23f   :  { %2432 = vpow2.f32 %v1870_v11 }
 0x240   :  { %2434 = vpow2.f32 %v1869_v12 }
 0x249   :  { %v2433_v24 = vpop.eup %2432 }
 0x24a   :  { %v2435_v25 = vpop.eup %2434  ;;  %v683_v27 = vadd.f32 1.0, %v2433_v24 }
 0x24b   :  { %v673_v29 = vadd.f32 1.0, %v2435_v25  ;;  %v702_v25 = vld [vmem:[#allocation2 + $0x8] sm:$0x30] }
 0x24c   :  { %2436 = vrcp.f32 %v683_v27 }
 0x24d   :  { %2438 = vrcp.f32 %v673_v29 }
 0x24e   :  { %2440 = vpow2.f32 %v1868_v28 }
 0x256   :  { %v2437_v38 = vpop.eup %2436 }
 0x257   :  { %v2439_v43 = vpop.eup %2438  ;;  %v698_v45 = vmul.f32 %v2437_v38, %v696_v37  ;;  %v693_v62 = vsub.f32 1.0, %v2437_v38  ;;  %v701_v37 = vld [vmem:[#allocation2] sm:$0x30] }
 0x258   :  { %v690_v46 = vmul.f32 %v2439_v43, %v688_v42  ;;  %v2441_v47 = vpop.eup %2440 }
 0x259   :  { %v663_v59 = vadd.f32 1.0, %v2441_v47 }
 0x25a   :  { %v691_v57 = vadd.f32 %v690_v46, %v513_v52 }
 0x25c   :  { %2442 = vtanh.f32 %v691_v57 }
 0x25d   :  { %2444 = vrcp.f32 %v663_v59 }
 0x266   :  { %v2443_v63 = vpop.eup %2442 }
 0x267   :  { %v694_v5 = vmul.f32 %v2443_v63, %v693_v62  ;;  %v2445_v8 = vpop.eup %2444 }
 0x269   :  { %v699_v6 = vadd.f32 %v698_v45, %v694_v5 }
 0x26b   :  { %v2899_v9 = vmul.f32 %v2445_v8, %v699_v6 }
 0x26d   :  { %v706_v55 = vrot.slane %v2899_v9, 2  ;;  %v889_v57 = vrot.slane %v2899_v9, 6 }
 0x26f   :  { %773 = vmatmul.mubr.f32.vlgmr.msra.gmra.mrb[8].mxu0 %v706_v55  ;;  %844 = vmatmul.mubr.f32.vlgmr.msra.gmra.mrb[8].mxu1 %v706_v55  ;;  %v704_v55 = vld [vmem:[#allocation2 + $0x18] sm:$0x30] }
 0x270   :  { %2092 = vmatpush1.bf16.msra.mxu0 %v2712_v22  ;;  %2124 = vmatpush1.bf16.msra.mxu1 %v2715_v26 }
 0x271   :  { %2094 = vmatprep.subr.bf16.mxu0 %v2719_v30  ;;  %2126 = vmatprep.subr.bf16.mxu1 %v2721_v31 }
 0x272   :  { %965 = vmatprep.mubr.f32.mxu0 %v2632_v0  ;;  %1036 = vmatprep.mubr.f32.mxu1 %v2632_v0 }
 0x274   :  { %2096 = vmatpush1.bf16.msra.mxu0 %v2725_v35  ;;  %2128 = vmatpush1.bf16.msra.mxu1 %v2729_v39 }
 0x275   :  { %2098 = vmatprep.subr.bf16.mxu0 %v2731_v40  ;;  %2130 = vmatprep.subr.bf16.mxu1 %v2734_v44 }
 0x278   :  { %2100 = vmatpush1.bf16.msra.mxu0 %v2739_v51  ;;  %2132 = vmatpush1.bf16.msra.mxu1 %v2743_v53 }
 0x279   :  { %2102 = vmatprep.subr.bf16.mxu0 %v2745_v54  ;;  %2134 = vmatprep.subr.bf16.mxu1 %v2748_v58 }
 0x27c   :  { %2104 = vmatpush1.bf16.msra.mxu0 %v2751_v1  ;;  %2136 = vmatpush1.bf16.msra.mxu1 %v2755_v2 }
 0x27d   :  { %2106 = vmatprep.subr.bf16.mxu0 %v2757_v3  ;;  %2138 = vmatprep.subr.bf16.mxu1 %v2760_v7 }
 0x280   :  { %2108 = vmatpush1.bf16.msra.mxu0 %v2763_v13  ;;  %2140 = vmatpush1.bf16.msra.mxu1 %v2767_v15 }
 0x281   :  { %2110 = vmatprep.subr.bf16.mxu0 %v2769_v16  ;;  %2142 = vmatprep.subr.bf16.mxu1 %v2772_v23 }
 0x284   :  { %2112 = vmatpush1.bf16.msra.mxu0 %v2778_v32  ;;  %2144 = vmatpush1.bf16.msra.mxu1 %v2783_v33 }
 0x285   :  { %2114 = vmatprep.subr.bf16.mxu0 %v2785_v34  ;;  %2146 = vmatprep.subr.bf16.mxu1 %v2788_v41 }
 0x288   :  { %2116 = vmatpush1.bf16.msra.mxu0 %v2791_v48  ;;  %2148 = vmatpush1.bf16.msra.mxu1 %v2795_v49 }
 0x289   :  { %2118 = vmatprep.subr.bf16.mxu0 %v2797_v50  ;;  %2150 = vmatprep.subr.bf16.mxu1 %v2800_v56 }
 0x28c   :  { %2120 = vmatpush1.bf16.msra.mxu0 %v2803_v60  ;;  %2152 = vmatpush1.bf16.msra.mxu1 %v2807_v61 }
 0x28d   :  { %2154 = vmatprep.subr.bf16.mxu0 %v2708_v17  ;;  %2186 = vmatprep.subr.bf16.mxu1 %v2710_v21 }
 0x342   :  { %v774_v4 = vpop.f32.mrb[8].mxu0  ;;  %v845_v10 = vpop.f32.mrb[8].mxu1 }
 0x343   :  { %v871_v11 = vrot.slane %v845_v10, 4  ;;  %v776_v12 = vpop.f32.mrb[9].mxu0  ;;  %v847_v14 = vpop.f32.mrb[9].mxu1  ;;  %v851_v36 = vrot.slane %v774_v4, 4 }
 0x344   :  { %v861_v20 = vrot.slane %v776_v12, 4  ;;  %v880_v52 = vadd.f32 %v2856_v19, %v847_v14 }
 0x345   :  { %v873_v24 = vadd.f32 %v871_v11, %v703_v18  ;;  %v853_v38 = vadd.f32 %v851_v36, %v701_v37  ;;  %v896_v37 = vld [vmem:[#allocation2 + $0x10] sm:$0xc0] }
 0x346   :  { %v863_v27 = vadd.f32 %v861_v20, %v702_v25  ;;  %v882_v62 = vrot.slane %v880_v52, 4 }
 0x347   :  { %v1873_v28 = vmul.f32 -1.442695, %v873_v24  ;;  %v1871_v46 = vmul.f32 -1.442695, %v853_v38 }
 0x348   :  { %v1872_v29 = vmul.f32 -1.442695, %v863_v27 }
 0x349   :  { %2446 = vpow2.f32 %v1873_v28 }
 0x34a   :  { %2448 = vpow2.f32 %v1872_v29 }
 0x353   :  { %v2447_v42 = vpop.eup %2446 }
 0x354   :  { %v2449_v43 = vpop.eup %2448  ;;  %v877_v45 = vadd.f32 1.0, %v2447_v42 }
 0x355   :  { %v867_v47 = vadd.f32 1.0, %v2449_v43  ;;  %v895_v43 = vld [vmem:[#allocation2 + $0x8] sm:$0xc0] }
 0x356   :  { %2450 = vrcp.f32 %v877_v45 }
 0x357   :  { %2452 = vrcp.f32 %v867_v47 }
 0x358   :  { %2454 = vpow2.f32 %v1871_v46 }
 0x360   :  { %v2451_v59 = vpop.eup %2450 }
 0x361   :  { %v2453_v63 = vpop.eup %2452  ;;  %v891_v5 = vmul.f32 %v2451_v59, %v889_v57  ;;  %v887_v11 = vsub.f32 1.0, %v2451_v59  ;;  %v894_v57 = vld [vmem:[#allocation2] sm:$0xc0] }
 0x362   :  { %v884_v6 = vmul.f32 %v2453_v63, %v882_v62  ;;  %v2455_v8 = vpop.eup %2454 }
 0x363   :  { %v857_v10 = vadd.f32 1.0, %v2455_v8 }
 0x364   :  { %v885_v4 = vadd.f32 %v884_v6, %v704_v55 }
 0x366   :  { %2456 = vtanh.f32 %v885_v4 }
 0x367   :  { %2458 = vrcp.f32 %v857_v10 }
 0x370   :  { %v2457_v12 = vpop.eup %2456 }
 0x371   :  { %v888_v18 = vmul.f32 %v2457_v12, %v887_v11  ;;  %v2459_v24 = vpop.eup %2458 }
 0x373   :  { %v892_v20 = vadd.f32 %v891_v5, %v888_v18 }
 0x375   :  { %v2938_v25 = vmul.f32 %v2459_v24, %v892_v20 }
 0x377   :  { %v899_v9 = vrot.slane %v2938_v25, 4  ;;  %v1082_v4 = vrot.slane %v2938_v25, 6 }
 0x379   :  { %966 = vmatmul.mubr.f32.vlgmr.msra.gmra.mrb[10].mxu0 %v899_v9  ;;  %1037 = vmatmul.mubr.f32.vlgmr.msra.gmra.mrb[10].mxu1 %v899_v9  ;;  %v897_v9 = vld [vmem:[#allocation2 + $0x18] sm:$0xc0] }
 0x37a   :  { %2156 = vmatpush1.bf16.msra.mxu0 %v2712_v22  ;;  %2188 = vmatpush1.bf16.msra.mxu1 %v2715_v26 }
 0x37b   :  { %2158 = vmatprep.subr.bf16.mxu0 %v2719_v30  ;;  %2190 = vmatprep.subr.bf16.mxu1 %v2721_v31 }
 0x37c   :  { %1158 = vmatprep.mubr.f32.mxu0 %v2632_v0  ;;  %1229 = vmatprep.mubr.f32.mxu1 %v2632_v0 }
 0x37e   :  { %2160 = vmatpush1.bf16.msra.mxu0 %v2725_v35  ;;  %2192 = vmatpush1.bf16.msra.mxu1 %v2729_v39 }
 0x37f   :  { %2162 = vmatprep.subr.bf16.mxu0 %v2731_v40  ;;  %2194 = vmatprep.subr.bf16.mxu1 %v2734_v44 }
 0x382   :  { %2164 = vmatpush1.bf16.msra.mxu0 %v2739_v51  ;;  %2196 = vmatpush1.bf16.msra.mxu1 %v2743_v53 }
 0x383   :  { %2166 = vmatprep.subr.bf16.mxu0 %v2745_v54  ;;  %2198 = vmatprep.subr.bf16.mxu1 %v2748_v58 }
 0x386   :  { %2168 = vmatpush1.bf16.msra.mxu0 %v2751_v1  ;;  %2200 = vmatpush1.bf16.msra.mxu1 %v2755_v2 }
 0x387   :  { %2170 = vmatprep.subr.bf16.mxu0 %v2757_v3  ;;  %2202 = vmatprep.subr.bf16.mxu1 %v2760_v7 }
 0x38a   :  { %2172 = vmatpush1.bf16.msra.mxu0 %v2763_v13  ;;  %2204 = vmatpush1.bf16.msra.mxu1 %v2767_v15 }
 0x38b   :  { %2174 = vmatprep.subr.bf16.mxu0 %v2769_v16  ;;  %2206 = vmatprep.subr.bf16.mxu1 %v2772_v23 }
 0x38e   :  { %2176 = vmatpush1.bf16.msra.mxu0 %v2778_v32  ;;  %2208 = vmatpush1.bf16.msra.mxu1 %v2783_v33 }
 0x38f   :  { %2178 = vmatprep.subr.bf16.mxu0 %v2785_v34  ;;  %2210 = vmatprep.subr.bf16.mxu1 %v2788_v41 }
 0x392   :  { %2180 = vmatpush1.bf16.msra.mxu0 %v2791_v48  ;;  %2212 = vmatpush1.bf16.msra.mxu1 %v2795_v49 }
 0x393   :  { %2182 = vmatprep.subr.bf16.mxu0 %v2797_v50  ;;  %2214 = vmatprep.subr.bf16.mxu1 %v2800_v56 }
 0x396   :  { %2184 = vmatpush1.bf16.msra.mxu0 %v2803_v60  ;;  %2216 = vmatpush1.bf16.msra.mxu1 %v2807_v61 }
 0x397   :  { %2218 = vmatprep.subr.bf16.mxu0 %v2708_v17  ;;  %2250 = vmatprep.subr.bf16.mxu1 %v2710_v21 }
 0x44c   :  { %v967_v14 = vpop.f32.mrb[10].mxu0  ;;  %v1038_v27 = vpop.f32.mrb[10].mxu1 }
 0x44d   :  { %v1064_v28 = vrot.slane %v1038_v27, 2  ;;  %v969_v29 = vpop.f32.mrb[11].mxu0  ;;  %v1040_v36 = vpop.f32.mrb[11].mxu1  ;;  %v1044_v52 = vrot.slane %v967_v14, 2 }
 0x44e   :  { %v1054_v38 = vrot.slane %v969_v29, 2  ;;  %v1073_v55 = vadd.f32 %v2856_v19, %v1040_v36 }
 0x44f   :  { %v1066_v42 = vadd.f32 %v1064_v28, %v896_v37  ;;  %v1046_v59 = vadd.f32 %v1044_v52, %v894_v57 }
 0x450   :  { %v1056_v45 = vadd.f32 %v1054_v38, %v895_v43  ;;  %v1075_v11 = vrot.slane %v1073_v55, 2 }
 0x451   :  { %v1876_v46 = vmul.f32 -1.442695, %v1066_v42  ;;  %v1874_v6 = vmul.f32 -1.442695, %v1046_v59 }
 0x452   :  { %v1875_v47 = vmul.f32 -1.442695, %v1056_v45 }
 0x453   :  { %2460 = vpow2.f32 %v1876_v46  ;;  %v1088_v46 = vld [vmem:[#allocation2 + $0x28] sm:$0x3] }
 0x454   :  { %2462 = vpow2.f32 %v1875_v47 }
 0x45d   :  { %v2461_v62 = vpop.eup %2460 }
 0x45e   :  { %v2463_v63 = vpop.eup %2462  ;;  %v1070_v5 = vadd.f32 1.0, %v2461_v62  ;;  %v1089_v62 = vld [vmem:[#allocation2 + $0x30] sm:$0x3] }
 0x45f   :  { %v1060_v8 = vadd.f32 1.0, %v2463_v63 }
 0x460   :  { %2464 = vrcp.f32 %v1070_v5 }
 0x461   :  { %2466 = vrcp.f32 %v1060_v8 }
 0x462   :  { %2468 = vpow2.f32 %v1874_v6  ;;  %v1087_v6 = vld [vmem:[#allocation2 + $0x20] sm:$0x3] }
 0x46a   :  { %v2465_v10 = vpop.eup %2464 }
 0x46b   :  { %v2467_v12 = vpop.eup %2466  ;;  %v1084_v18 = vmul.f32 %v2465_v10, %v1082_v4  ;;  %v1080_v28 = vsub.f32 1.0, %v2465_v10 }
 0x46c   :  { %v1077_v20 = vmul.f32 %v2467_v12, %v1075_v11  ;;  %v2469_v24 = vpop.eup %2468 }
 0x46d   :  { %v1050_v27 = vadd.f32 1.0, %v2469_v24 }
 0x46e   :  { %v1078_v14 = vadd.f32 %v1077_v20, %v897_v9 }
 0x470   :  { %2470 = vtanh.f32 %v1078_v14  ;;  %v1090_v14 = vld [vmem:[#allocation2 + $0x38] sm:$0x3] }
 0x471   :  { %2472 = vrcp.f32 %v1050_v27 }
 0x47a   :  { %v2471_v29 = vpop.eup %2470 }
 0x47b   :  { %v1081_v37 = vmul.f32 %v2471_v29, %v1080_v28  ;;  %v2473_v42 = vpop.eup %2472 }
 0x47d   :  { %v1085_v38 = vadd.f32 %v1084_v18, %v1081_v37 }
 0x47f   :  { %v1086_v43 = vmul.f32 %v2473_v42, %v1085_v38 }
 0x481   :  { %v2977_v36 = vrot.slane %v1086_v43, 6 }
 0x483   :  { %1159 = vmatmul.mubr.f32.vlgmr.msra.gmra.mrb[12].mxu0 %v2977_v36  ;;  %1230 = vmatmul.mubr.f32.vlgmr.msra.gmra.mrb[12].mxu1 %v2977_v36 }
 0x484   :  { %2220 = vmatpush1.bf16.msra.mxu0 %v2712_v22  ;;  %2252 = vmatpush1.bf16.msra.mxu1 %v2715_v26 }
 0x485   :  { %2222 = vmatprep.subr.bf16.mxu0 %v2719_v30  ;;  %2254 = vmatprep.subr.bf16.mxu1 %v2721_v31 }
 0x486   :  { %1334 = vmatprep.mubr.f32.mxu0 %v2632_v0  ;;  %1405 = vmatprep.mubr.f32.mxu1 %v2632_v0 }
 0x488   :  { %2224 = vmatpush1.bf16.msra.mxu0 %v2725_v35  ;;  %2256 = vmatpush1.bf16.msra.mxu1 %v2729_v39 }
 0x489   :  { %2226 = vmatprep.subr.bf16.mxu0 %v2731_v40  ;;  %2258 = vmatprep.subr.bf16.mxu1 %v2734_v44 }
 0x48c   :  { %2228 = vmatpush1.bf16.msra.mxu0 %v2739_v51  ;;  %2260 = vmatpush1.bf16.msra.mxu1 %v2743_v53 }
 0x48d   :  { %2230 = vmatprep.subr.bf16.mxu0 %v2745_v54  ;;  %2262 = vmatprep.subr.bf16.mxu1 %v2748_v58 }
 0x490   :  { %2232 = vmatpush1.bf16.msra.mxu0 %v2751_v1  ;;  %2264 = vmatpush1.bf16.msra.mxu1 %v2755_v2 }
 0x491   :  { %2234 = vmatprep.subr.bf16.mxu0 %v2757_v3  ;;  %2266 = vmatprep.subr.bf16.mxu1 %v2760_v7 }
 0x494   :  { %2236 = vmatpush1.bf16.msra.mxu0 %v2763_v13  ;;  %2268 = vmatpush1.bf16.msra.mxu1 %v2767_v15 }
 0x495   :  { %2238 = vmatprep.subr.bf16.mxu0 %v2769_v16  ;;  %2270 = vmatprep.subr.bf16.mxu1 %v2772_v23 }
 0x498   :  { %2240 = vmatpush1.bf16.msra.mxu0 %v2778_v32  ;;  %2272 = vmatpush1.bf16.msra.mxu1 %v2783_v33 }
 0x499   :  { %2242 = vmatprep.subr.bf16.mxu0 %v2785_v34  ;;  %2274 = vmatprep.subr.bf16.mxu1 %v2788_v41 }
 0x49c   :  { %2244 = vmatpush1.bf16.msra.mxu0 %v2791_v48  ;;  %2276 = vmatpush1.bf16.msra.mxu1 %v2795_v49 }
 0x49d   :  { %2246 = vmatprep.subr.bf16.mxu0 %v2797_v50  ;;  %2278 = vmatprep.subr.bf16.mxu1 %v2800_v56 }
 0x4a0   :  { %2248 = vmatpush1.bf16.msra.mxu0 %v2803_v60  ;;  %2280 = vmatpush1.bf16.msra.mxu1 %v2807_v61 }
 0x4a1   :  { %2282 = vmatprep.subr.bf16.mxu0 %v2708_v17  ;;  %2314 = vmatprep.subr.bf16.mxu1 %v2710_v21 }
 0x556   :  { %v1160_v25 = vpop.f32.mrb[12].mxu0  ;;  %v1231_v45 = vpop.f32.mrb[12].mxu1 }
 0x557   :  { %v1162_v47 = vpop.f32.mrb[13].mxu0  ;;  %v1233_v52 = vpop.f32.mrb[13].mxu1  ;;  %v1250_v63 = vadd.f32 %v1231_v45, %v1089_v62  ;;  %v1236_v8 = vadd.f32 %v1160_v25, %v1087_v6  ;;  %v1268_v62 = vld [vmem:[#allocation2 + $0x30] sm:$0xc]  ;;  %v1267_v6 = vld [vmem:[#allocation2 + $0x28] sm:$0xc] }
 0x558   :  { %v1243_v57 = vadd.f32 %v1162_v47, %v1088_v46  ;;  %v1257_v18 = vadd.f32 %v2856_v19, %v1233_v52 }
 0x559   :  { %v1879_v5 = vmul.f32 -1.442695, %v1250_v63  ;;  %v1877_v4 = vmul.f32 -1.442695, %v1236_v8 }
 0x55a   :  { %v1878_v59 = vmul.f32 -1.442695, %v1243_v57 }
 0x55c   :  { %2474 = vpow2.f32 %v1878_v59 }
 0x55d   :  { %2476 = vpow2.f32 %v1879_v5 }
 0x566   :  { %v2475_v55 = vpop.eup %2474 }
 0x567   :  { %v1247_v10 = vadd.f32 1.0, %v2475_v55  ;;  %v2477_v11 = vpop.eup %2476 }
 0x568   :  { %v1254_v12 = vadd.f32 1.0, %v2477_v11  ;;  %v1266_v11 = vld [vmem:[#allocation2 + $0x20] sm:$0xc] }
 0x569   :  { %2478 = vrcp.f32 %v1247_v10 }
 0x56a   :  { %2480 = vpow2.f32 %v1877_v4 }
 0x56b   :  { %2482 = vrcp.f32 %v1254_v12 }
 0x573   :  { %v2479_v20 = vpop.eup %2478 }
 0x574   :  { %v1258_v24 = vmul.f32 %v2479_v20, %v1257_v18  ;;  %v2481_v9 = vpop.eup %2480 }
 0x575   :  { %v1240_v28 = vadd.f32 1.0, %v2481_v9  ;;  %v2483_v29 = vpop.eup %2482 }
 0x576   :  { %v1259_v27 = vadd.f32 %v1258_v24, %v1090_v14  ;;  %v1261_v37 = vsub.f32 1.0, %v2483_v29  ;;  %v1263_v43 = vmul.f32 %v2483_v29, %v2977_v36 }
 0x578   :  { %2484 = vtanh.f32 %v1259_v27 }
 0x579   :  { %2486 = vrcp.f32 %v1240_v28 }
 0x582   :  { %v2485_v38 = vpop.eup %2484 }
 0x583   :  { %v1262_v42 = vmul.f32 %v2485_v38, %v1261_v37  ;;  %v2487_v45 = vpop.eup %2486 }
 0x585   :  { %v1264_v25 = vadd.f32 %v1263_v43, %v1262_v42  ;;  %v1269_v43 = vld [vmem:[#allocation2 + $0x38] sm:$0xc] }
 0x587   :  { %v3017_v46 = vmul.f32 %v2487_v45, %v1264_v25 }
 0x589   :  { %1335 = vmatmul.mubr.f32.vlgmr.msra.gmra.mrb[14].mxu0 %v3017_v46  ;;  %1406 = vmatmul.mubr.f32.vlgmr.msra.gmra.mrb[14].mxu1 %v3017_v46  ;;  %v1452_v14 = vrot.slane %v3017_v46, 6 }
 0x58a   :  { %2284 = vmatpush1.bf16.msra.mxu0 %v2712_v22  ;;  %2316 = vmatpush1.bf16.msra.mxu1 %v2715_v26 }
 0x58b   :  { %2286 = vmatprep.subr.bf16.mxu0 %v2719_v30  ;;  %2318 = vmatprep.subr.bf16.mxu1 %v2721_v31 }
 0x58c   :  { %1528 = vmatprep.mubr.f32.mxu0 %v2632_v0  ;;  %1599 = vmatprep.mubr.f32.mxu1 %v2632_v0 }
 0x58e   :  { %2288 = vmatpush1.bf16.msra.mxu0 %v2725_v35  ;;  %2320 = vmatpush1.bf16.msra.mxu1 %v2729_v39 }
 0x58f   :  { %2290 = vmatprep.subr.bf16.mxu0 %v2731_v40  ;;  %2322 = vmatprep.subr.bf16.mxu1 %v2734_v44 }
 0x592   :  { %2292 = vmatpush1.bf16.msra.mxu0 %v2739_v51  ;;  %2324 = vmatpush1.bf16.msra.mxu1 %v2743_v53 }
 0x593   :  { %2294 = vmatprep.subr.bf16.mxu0 %v2745_v54  ;;  %2326 = vmatprep.subr.bf16.mxu1 %v2748_v58 }
 0x596   :  { %2296 = vmatpush1.bf16.msra.mxu0 %v2751_v1  ;;  %2328 = vmatpush1.bf16.msra.mxu1 %v2755_v2 }
 0x597   :  { %2298 = vmatprep.subr.bf16.mxu0 %v2757_v3  ;;  %2330 = vmatprep.subr.bf16.mxu1 %v2760_v7 }
 0x59a   :  { %2300 = vmatpush1.bf16.msra.mxu0 %v2763_v13  ;;  %2332 = vmatpush1.bf16.msra.mxu1 %v2767_v15 }
 0x59b   :  { %2302 = vmatprep.subr.bf16.mxu0 %v2769_v16  ;;  %2334 = vmatprep.subr.bf16.mxu1 %v2772_v23 }
 0x59e   :  { %2304 = vmatpush1.bf16.msra.mxu0 %v2778_v32  ;;  %2336 = vmatpush1.bf16.msra.mxu1 %v2783_v33 }
 0x59f   :  { %2306 = vmatprep.subr.bf16.mxu0 %v2785_v34  ;;  %2338 = vmatprep.subr.bf16.mxu1 %v2788_v41 }
 0x5a2   :  { %2308 = vmatpush1.bf16.msra.mxu0 %v2791_v48  ;;  %2340 = vmatpush1.bf16.msra.mxu1 %v2795_v49 }
 0x5a3   :  { %2310 = vmatprep.subr.bf16.mxu0 %v2797_v50  ;;  %2342 = vmatprep.subr.bf16.mxu1 %v2800_v56 }
 0x5a6   :  { %2312 = vmatpush1.bf16.msra.mxu0 %v2803_v60  ;;  %2344 = vmatpush1.bf16.msra.mxu1 %v2807_v61 }
 0x5a7   :  { %2346 = vmatprep.subr.bf16.mxu0 %v2708_v17  ;;  %2378 = vmatprep.subr.bf16.mxu1 %v2710_v21 }
 0x65c   :  { %v1336_v36 = vpop.f32.mrb[14].mxu0  ;;  %v1407_v47 = vpop.f32.mrb[14].mxu1 }
 0x65d   :  { %v1433_v52 = vrot.slane %v1407_v47, 6  ;;  %v1338_v57 = vpop.f32.mrb[15].mxu0  ;;  %v1409_v59 = vpop.f32.mrb[15].mxu1  ;;  %v1413_v10 = vrot.slane %v1336_v36, 6 }
 0x65e   :  { %v1423_v63 = vrot.slane %v1338_v57, 6  ;;  %v1442_v9 = vadd.f32 %v2856_v19, %v1409_v59 }
 0x65f   :  { %v1435_v5 = vadd.f32 %v1433_v52, %v1268_v62  ;;  %v1415_v12 = vadd.f32 %v1413_v10, %v1266_v11 }
 0x660   :  { %v1425_v8 = vadd.f32 %v1423_v63, %v1267_v6  ;;  %v1444_v28 = vrot.slane %v1442_v9, 6  ;;  %v1651_v9 = vld [vmem:[#allocation2 + $0x28] sm:$0xc0] }
 0x661   :  { %v1882_v55 = vmul.f32 -1.442695, %v1435_v5  ;;  %v1880_v20 = vmul.f32 -1.442695, %v1415_v12 }
 0x662   :  { %v1881_v4 = vmul.f32 -1.442695, %v1425_v8 }
 0x663   :  { %2488 = vpow2.f32 %v1882_v55 }
 0x664   :  { %2490 = vpow2.f32 %v1881_v4 }
 0x66d   :  { %v2489_v17 = vpop.eup %2488 }
 0x66e   :  { %v2491_v18 = vpop.eup %2490  ;;  %v1439_v21 = vadd.f32 1.0, %v2489_v17 }
 0x66f   :  { %v1429_v24 = vadd.f32 1.0, %v2491_v18 }
 0x670   :  { %2492 = vrcp.f32 %v1439_v21  ;;  %v1652_v21 = vld [vmem:[#allocation2 + $0x30] sm:$0xc0] }
 0x671   :  { %2494 = vrcp.f32 %v1429_v24 }
 0x672   :  { %2496 = vpow2.f32 %v1880_v20 }
 0x67a   :  { %v2493_v27 = vpop.eup %2492 }
 0x67b   :  { %v2495_v29 = vpop.eup %2494  ;;  %v1454_v37 = vmul.f32 %v2493_v27, %v1452_v14  ;;  %v1449_v36 = vsub.f32 1.0, %v2493_v27 }
 0x67c   :  { %v1446_v38 = vmul.f32 %v2495_v29, %v1444_v28  ;;  %v2497_v42 = vpop.eup %2496 }
 0x67d   :  { %v1419_v45 = vadd.f32 1.0, %v2497_v42 }
 0x67e   :  { %v1447_v25 = vadd.f32 %v1446_v38, %v1269_v43 }
 0x680   :  { %2498 = vtanh.f32 %v1447_v25 }
 0x681   :  { %2500 = vrcp.f32 %v1419_v45 }
 0x68a   :  { %v2499_v47 = vpop.eup %2498 }
 0x68b   :  { %v1450_v52 = vmul.f32 %v2499_v47, %v1449_v36  ;;  %v2501_v62 = vpop.eup %2500  ;;  %v2530_v47 = vld [vmem:[%s3113_s4] ss:$0 sm:$0xff]  ;;  %s2597_s4 = scalar_lea.vmem %s1851_s11, 32 }
 0x68c   :  { %p2598_p10 = scmp.ne.s32.totalorder %s1851_s11, %s2597_s4  ;;  %p2603_p12 = scmp.lt.s32.totalorder %s2597_s4, %s2597_s4 }
 0x68d   :  { %v1455_v57 = vadd.f32 %v1454_v37, %v1450_v52  ;;  %v1650_v37 = vld [vmem:[#allocation2 + $0x20] sm:$0xc0] }
 0x68e   :  { %p2604_p13 = por %p2603_p12, %p2602_p11 }
 0x68f   :  { %v3057_v63 = vmul.f32 %v2501_v62, %v1455_v57 }
 0x690   :  { %p2605_p0 = pnand %p2604_p13, %p2598_p10 }
 0x691   :  { %v1462_v46 = vrot.slane %v3057_v63, 2 }
 0x693   :  { %1529 = vmatmul.mubr.f32.vlgmr.msra.gmra.mrb[16].mxu0 %v1462_v46  ;;  %1600 = vmatmul.mubr.f32.vlgmr.msra.gmra.mrb[16].mxu1 %v1462_v46 }
 0x694   :  { %2348 = vmatpush1.bf16.msra.mxu0 %v2712_v22  ;;  %2380 = vmatpush1.bf16.msra.mxu1 %v2715_v26 }
 0x695   :  { %2350 = vmatprep.subr.bf16.mxu0 %v2719_v30  ;;  %2382 = vmatprep.subr.bf16.mxu1 %v2721_v31 }
 0x696   :  { %1721 = vmatprep.mubr.f32.mxu0 %v2632_v0  ;;  %1792 = vmatprep.mubr.f32.mxu1 %v2632_v0 }
 0x698   :  { %2352 = vmatpush1.bf16.msra.mxu0 %v2725_v35  ;;  %2384 = vmatpush1.bf16.msra.mxu1 %v2729_v39  ;;  %v1459_v35 = vld [vmem:[#allocation2 + $0x30] sm:$0x30] }
 0x699   :  { %2354 = vmatprep.subr.bf16.mxu0 %v2731_v40  ;;  %2386 = vmatprep.subr.bf16.mxu1 %v2734_v44  ;;  %v1458_v44 = vld [vmem:[#allocation2 + $0x28] sm:$0x30] }
 0x69c   :  { %2356 = vmatpush1.bf16.msra.mxu0 %v2739_v51  ;;  %2388 = vmatpush1.bf16.msra.mxu1 %v2743_v53 }
 0x69d   :  { %2358 = vmatprep.subr.bf16.mxu0 %v2745_v54  ;;  %2390 = vmatprep.subr.bf16.mxu1 %v2748_v58 }
 0x6a0   :  { %2360 = vmatpush1.bf16.msra.mxu0 %v2751_v1  ;;  %2392 = vmatpush1.bf16.msra.mxu1 %v2755_v2  ;;  %v1457_v1 = vld [vmem:[#allocation2 + $0x20] sm:$0x30] }
 0x6a1   :  { %2362 = vmatprep.subr.bf16.mxu0 %v2757_v3  ;;  %2394 = vmatprep.subr.bf16.mxu1 %v2760_v7 }
 0x6a4   :  { %2364 = vmatpush1.bf16.msra.mxu0 %v2763_v13  ;;  %2396 = vmatpush1.bf16.msra.mxu1 %v2767_v15 }
 0x6a5   :  { %2366 = vmatprep.subr.bf16.mxu0 %v2769_v16  ;;  %2398 = vmatprep.subr.bf16.mxu1 %v2772_v23 }
 0x6a8   :  { %2368 = vmatpush1.bf16.msra.mxu0 %v2778_v32  ;;  %2400 = vmatpush1.bf16.msra.mxu1 %v2783_v33  ;;  %v1645_v32 = vrot.slane %v3057_v63, 6 }
 0x6a9   :  { %2370 = vmatprep.subr.bf16.mxu0 %v2785_v34  ;;  %2402 = vmatprep.subr.bf16.mxu1 %v2788_v41 }
 0x6ac   :  { %2372 = vmatpush1.bf16.msra.mxu0 %v2791_v48  ;;  %2404 = vmatpush1.bf16.msra.mxu1 %v2795_v49 }
 0x6ad   :  { %2374 = vmatprep.subr.bf16.mxu0 %v2797_v50  ;;  %2406 = vmatprep.subr.bf16.mxu1 %v2800_v56  ;;  %v1460_v56 = vld [vmem:[#allocation2 + $0x38] sm:$0x30] }
 0x6b0   :  { %2376 = vmatpush1.bf16.msra.mxu0 %v2803_v60  ;;  %2408 = vmatpush1.bf16.msra.mxu1 %v2807_v61 }
 0x766   :  { %v1530_v0 = vpop.f32.mrb[16].mxu0  ;;  %v1601_v22 = vpop.f32.mrb[16].mxu1 }
 0x767   :  { %v1627_v26 = vrot.slane %v1601_v22, 4  ;;  %v1532_v30 = vpop.f32.mrb[17].mxu0  ;;  %v1603_v31 = vpop.f32.mrb[17].mxu1  ;;  %v1607_v58 = vrot.slane %v1530_v0, 4 }
 0x768   :  { %v1617_v39 = vrot.slane %v1532_v30, 4  ;;  %v1636_v23 = vadd.f32 %v2856_v19, %v1603_v31  ;;  %v1653_v30 = vld [vmem:[#allocation2 + $0x38] sm:$0xc0] }
 0x769   :  { %v1629_v40 = vadd.f32 %v1627_v26, %v1459_v35  ;;  %v1609_v2 = vadd.f32 %v1607_v58, %v1457_v1 }
 0x76a   :  { %v1619_v51 = vadd.f32 %v1617_v39, %v1458_v44  ;;  %v1638_v34 = vrot.slane %v1636_v23, 4 }
 0x76b   :  { %v1885_v53 = vmul.f32 -1.442695, %v1629_v40  ;;  %v1883_v15 = vmul.f32 -1.442695, %v1609_v2 }
 0x76c   :  { %v1884_v54 = vmul.f32 -1.442695, %v1619_v51 }
 0x76d   :  { %2502 = vpow2.f32 %v1885_v53 }
 0x76e   :  { %2504 = vpow2.f32 %v1884_v54 }
 0x777   :  { %v2503_v3 = vpop.eup %2502 }
 0x778   :  { %v2505_v7 = vpop.eup %2504  ;;  %v1633_v13 = vadd.f32 1.0, %v2503_v3 }
 0x779   :  { %v1623_v16 = vadd.f32 1.0, %v2505_v7 }
 0x77a   :  { %2506 = vrcp.f32 %v1633_v13 }
 0x77b   :  { %2508 = vrcp.f32 %v1623_v16 }
 0x77c   :  { %2510 = vpow2.f32 %v1883_v15 }
 0x784   :  { %v2507_v33 = vpop.eup %2506 }
 0x785   :  { %v2509_v41 = vpop.eup %2508  ;;  %v1647_v48 = vmul.f32 %v2507_v33, %v1645_v32  ;;  %v1643_v59 = vsub.f32 1.0, %v2507_v33 }
 0x786   :  { %v1640_v49 = vmul.f32 %v2509_v41, %v1638_v34  ;;  %v2511_v50 = vpop.eup %2510 }
 0x787   :  { %v1613_v61 = vadd.f32 1.0, %v2511_v50 }
 0x788   :  { %v1641_v60 = vadd.f32 %v1640_v49, %v1460_v56 }
 0x78a   :  { %2512 = vtanh.f32 %v1641_v60 }
 0x78b   :  { %2514 = vrcp.f32 %v1613_v61 }
 0x794   :  { %v2513_v5 = vpop.eup %2512 }
 0x795   :  { %v1644_v6 = vmul.f32 %v2513_v5, %v1643_v59  ;;  %v2515_v55 = vpop.eup %2514 }
 0x797   :  { %v1648_v8 = vadd.f32 %v1647_v48, %v1644_v6 }
 0x799   :  { %v1649_v4 = vmul.f32 %v2515_v55, %v1648_v8 }
 0x79b   :  { %v1655_v19 = vrot.slane %v1649_v4, 4  ;;  %v1838_v57 = vrot.slane %v1649_v4, 6 }
 0x79d   :  { %1722 = vmatmul.mubr.f32.vlgmr.msra.gmra.mrb[18].mxu0 %v1655_v19  ;;  %1793 = vmatmul.mubr.f32.vlgmr.msra.gmra.mrb[18].mxu1 %v1655_v19 }
 0x870   :  { %v1723_v10 = vpop.f32.mrb[18].mxu0  ;;  %v1794_v11 = vpop.f32.mrb[18].mxu1 }
 0x871   :  { %v1820_v12 = vrot.slane %v1794_v11, 2  ;;  %v1725_v17 = vpop.f32.mrb[19].mxu0  ;;  %v1796_v18 = vpop.f32.mrb[19].mxu1  ;;  %v1800_v29 = vrot.slane %v1723_v10, 2 }
 0x872   :  { %v1810_v20 = vrot.slane %v1725_v17, 2  ;;  %v1829_v52 = vadd.f32 %v2530_v47, %v1796_v18 }
 0x873   :  { %v1822_v24 = vadd.f32 %v1820_v12, %v1652_v21  ;;  %v1802_v38 = vadd.f32 %v1800_v29, %v1650_v37 }
 0x874   :  { %v1812_v14 = vadd.f32 %v1810_v20, %v1651_v9  ;;  %v1831_v63 = vrot.slane %v1829_v52, 2 }
 0x875   :  { %v1888_v27 = vmul.f32 -1.442695, %v1822_v24  ;;  %v1886_v45 = vmul.f32 -1.442695, %v1802_v38 }
 0x876   :  { %v1887_v28 = vmul.f32 -1.442695, %v1812_v14 }
 0x877   :  { %2516 = vpow2.f32 %v1888_v27 }
 0x878   :  { %2518 = vpow2.f32 %v1887_v28 }
 0x881   :  { %v2517_v42 = vpop.eup %2516 }
 0x882   :  { %v2519_v43 = vpop.eup %2518  ;;  %v1826_v25 = vadd.f32 1.0, %v2517_v42 }
 0x883   :  { %v1816_v36 = vadd.f32 1.0, %v2519_v43 }
 0x884   :  { %2520 = vrcp.f32 %v1826_v25 }
 0x885   :  { %2522 = vrcp.f32 %v1816_v36 }
 0x886   :  { %2524 = vpow2.f32 %v1886_v45 }
 0x88e   :  { %v2521_v62 = vpop.eup %2520 }
 0x88f   :  { %v2523_v46 = vpop.eup %2522  ;;  %v1840_v0 = vmul.f32 %v2521_v62, %v1838_v57  ;;  %v1836_v39 = vsub.f32 1.0, %v2521_v62 }
 0x890   :  { %v1833_v22 = vmul.f32 %v2523_v46, %v1831_v63  ;;  %v2525_v26 = vpop.eup %2524 }
 0x891   :  { %v1806_v35 = vadd.f32 1.0, %v2525_v26 }
 0x892   :  { %v1834_v31 = vadd.f32 %v1833_v22, %v1653_v30 }
 0x894   :  { %2526 = vtanh.f32 %v1834_v31 }
 0x895   :  { %2528 = vrcp.f32 %v1806_v35 }
 0x89e   :  { %v2527_v40 = vpop.eup %2526 }
 0x89f   :  { %v1837_v44 = vmul.f32 %v2527_v40, %v1836_v39  ;;  %v2529_v53 = vpop.eup %2528 }
 0x8a1   :  { %v1841_v51 = vadd.f32 %v1840_v0, %v1837_v44 }
 0x8a3   :  { %v1842_v54 = vmul.f32 %v2529_v53, %v1841_v51 }
 0x8a5   :  { %1843 = vst [vmem:[#allocation9 - $0x6] sm:$0xc0] %v1842_v54 }
 0x8a6   :  { %2608 = shalt.err (!%p2605_p0)
}
 0x8a7   :  { %s2609_s14 = scalar_lea.hbm %s3114_s5, 32 }
 0x8a8   :  { %p2610_p1 = scmp.ne.s32.totalorder %s3114_s5, %s2609_s14  ;;  %p2613_p2 = scmp.lt.u32.totalorder %s2609_s14, %s3114_s5 }
 0x8aa   :  { %p2615_p3 = pnand %p2613_p2, %p2610_p1 }
 0x8ac   :  { %2618 = shalt.err (!%p2615_p3)
}
 0x8ad   :  { %1853 = dma.vmem_to_hbm [thread:$0]  %s1851_s11, 32, %s3114_s5, [#allocation5]  }
 0x8ae   :  { %2623 = dma.done.wait [#allocation5], 32  }
 0x8af   :  { %2624 = vsyncadd [#allocation5], 4294967264 }
 0x8b0   :  { %1857 = vsyncpa [#allocation4], 1 }
 0x8b1   :  { %1858 = vsyncpa [#allocation7], 1 }
 0x8b2   :  { %1859 = vsyncpa [#allocation5], 1 }

</bundles_post_ra>
